<compile_context>
chip_gen: v7x
topology: tpu7x:2x2x1
jax: 0.10.0
libtpu: 0.0.40
codegen_flags: <defaults>
</compile_context>

<pallas_src>
import math
import functools

import jax
import jax.numpy as jnp
import numpy as np
from jax import lax
from jax.experimental import pallas as pl
from jax.experimental.pallas import tpu as pltpu


# ----------------------------- Pallas kernel ------------------------------ #
def _mfn_kernel(num_layers, F, H,
                x_ref,              # (in_f+1, tb)  last row = ones (bias fold)
                wxh_ref,            # (F+H, in_f+1) rows 0:F = 2pi*f-layer, F: = 0.5*H1
                wt_ref, bt_ref,     # (2H, 2F), (2H, 1)  stacked T1/T2, 0.5-scaled
                wl_ref, bl_ref,     # (L', H, H), (L', H, 1)  0.5-scaled
                wo_ref, bo_ref,     # (out_f, H), (out_f, 1)
                out_ref):           # (out_f, tb)
    x_aug = x_ref[...]

    # One stacked dot: Fourier pre-activation (already 2*pi-scaled, bias folded)
    # and H1 pre-activation (already 0.5-scaled, bias folded).
    fh = jnp.dot(wxh_ref[...], x_aug, preferred_element_type=jnp.float32)
    f = fh[:F]
    h_pre = fh[F:]

    s = jnp.sin(f)
    c = jnp.cos(f)
    sc = jnp.concatenate([s, c], axis=0)            # (2F, tb)

    # One stacked dot for both transform branches (already 0.5-scaled).
    tt = jnp.dot(wt_ref[...], sc, preferred_element_type=jnp.float32) + bt_ref[...]
    tt = 0.5 * (jnp.tanh(tt) + 1.0)                 # sigmoid(z) == 0.5*(tanh(z/2)+1)
    t1 = tt[:H]
    t2 = tt[H:]
    d = t2 - t1                                     # hoisted gate algebra

    h = 0.5 * (jnp.tanh(h_pre) + 1.0)

    def gated(h_in, w, b):
        z = 0.5 * (jnp.tanh(jnp.dot(w, h_in, preferred_element_type=jnp.float32) + b)
                   + 1.0)
        return t1 + z * d

    if num_layers <= 4:
        for l in range(num_layers):                 # small static unroll
            h = gated(h, wl_ref[l], bl_ref[l])
    else:
        unroll = True if num_layers <= 16 else 2    # avoid huge code size for big L
        h = lax.fori_loop(0, num_layers,
                          lambda l, hc: gated(hc, wl_ref[l], bl_ref[l]),
                          h, unroll=unroll)

    out_ref[...] = (jnp.dot(wo_ref[...], h, preferred_element_type=jnp.float32)
                    + bo_ref[...]).astype(out_ref.dtype)


# ------------------------------- Wrapper ----------------------------------- #
def modified_fourier_net(x, params, *, batch_tile=None):
    """Modified_Fourier_Net forward on TPU via Pallas.

    x: (N, in_features) float32
    params (PyTorch nn.Linear layout, W = (out, in), b = (out,)):
        f_w (F, in), f_b (F,)
        t1_w / t2_w (H, 2F), t1_b / t2_b (H,)
        h1_w (H, in), h1_b (H,)
        layers_w (L, H, H), layers_b (L, H)
        out_w (out_f, H), out_b (out_f,)
    """
    N, in_f = x.shape
    F = params["f_w"].shape[0]
    H = params["h1_w"].shape[0]
    L = params["layers_w"].shape[0]
    out_f = params["out_w"].shape[0]

    # ---- host-side weight prep: scale folding, bias folding, stacking ----
    two_pi = 2.0 * math.pi
    wf = two_pi * params["f_w"].astype(jnp.float32)
    bf = two_pi * params["f_b"].astype(jnp.float32)
    wh = 0.5 * params["h1_w"].astype(jnp.float32)
    bh = 0.5 * params["h1_b"].astype(jnp.float32)
    wxh = jnp.concatenate(
        [jnp.concatenate([wf, bf[:, None]], axis=1),
         jnp.concatenate([wh, bh[:, None]], axis=1)], axis=0)        # (F+H, in_f+1)

    wt = 0.5 * jnp.concatenate([params["t1_w"], params["t2_w"]],
                               axis=0).astype(jnp.float32)            # (2H, 2F)
    bt = (0.5 * jnp.concatenate([params["t1_b"], params["t2_b"]],
                                axis=0).astype(jnp.float32))[:, None]  # (2H, 1)

    wo = params["out_w"].astype(jnp.float32)                          # (out_f, H)
    bo = params["out_b"].astype(jnp.float32)[:, None]                 # (out_f, 1)

    if L > 0:
        wl = 0.5 * params["layers_w"].astype(jnp.float32)             # (L, H, H)
        bl = (0.5 * params["layers_b"].astype(jnp.float32))[:, :, None]
    else:
        # zero-layer edge case: dummy block, never indexed by the kernel
        wl = jnp.zeros((1, H, H), jnp.float32)
        bl = jnp.zeros((1, H, 1), jnp.float32)

    weight_arrays = (wxh, wt, bt, wl, bl, wo, bo)
    weight_bytes = 4 * sum(int(np.prod(a.shape)) for a in weight_arrays)

    # ---- tile selection (lane-dense batch tiling, VMEM-budget aware) ----
    try:
        phys_vmem = int(pltpu.get_tpu_info().vmem_capacity_bytes)
    except Exception:
        phys_vmem = 64 << 20          # smallest per-core VMEM (v7x): safe fallback

    n128 = pl.cdiv(N, 128)            # number of 128-lane columns of data
    tb_cols = 64 if batch_tile is None else max(1, int(batch_tile) // 128)

    # conservative per-128-lane-column live set (f32 rows) for intermediates
    # plus double-buffered x/out pipeline blocks
    live_rows = 5 * F + 8 * H + 2 * (in_f + 1 + out_f)
    budget = int(0.7 * phys_vmem) - 2 * weight_bytes
    while tb_cols > 1 and 4 * live_rows * (tb_cols * 128) > budget:
        tb_cols //= 2

    # >= 2 grid steps when there is enough data (dual-TC sharding on v7x)
    if n128 >= 2:
        tb_cols = min(tb_cols, max(1, n128 // 2))
    else:
        tb_cols = 1
    # rebalance so padding waste on the last step is minimized
    steps = pl.cdiv(n128, tb_cols)
    tb_cols = pl.cdiv(n128, steps)

    tb = tb_cols * 128
    n_pad = pl.cdiv(N, tb) * tb
    grid = (n_pad // tb,)

    vmem_need = 4 * live_rows * tb + 2 * weight_bytes + (8 << 20)   # + headroom
    vmem_limit = int(min(phys_vmem, max(32 << 20, vmem_need)))

    # ---- layout plumbing: pad batch, transpose (batch -> lanes), ones row ----
    x_pad = jnp.pad(x.astype(jnp.float32), ((0, n_pad - N), (0, 0)))
    x_aug = jnp.concatenate([x_pad.T, jnp.ones((1, n_pad), jnp.float32)], axis=0)

    flops = 2 * n_pad * ((in_f + 1) * (F + H) + (2 * F) * (2 * H)
                         + L * H * H + H * out_f)
    transcendentals = n_pad * (2 * F + (3 + L) * H)
    bytes_accessed = 4 * n_pad * (in_f + 1 + out_f) + weight_bytes

    def _build_call(single_buffer_weights):
        def _resident(shape):
            nd = len(shape)
            idx = lambda i, _nd=nd: (0,) * _nd
            if single_buffer_weights:
                # constant index_map, never re-fetched -> single buffer saves VMEM
                return pl.BlockSpec(shape, idx, pipeline_mode=pl.Buffered(1))
            return pl.BlockSpec(shape, idx)

        in_specs = [
            pl.BlockSpec((in_f + 1, tb), lambda i: (0, i)),    # x^T (batch-tiled)
            _resident(wxh.shape),
            _resident(wt.shape), _resident(bt.shape),
            _resident(wl.shape), _resident(bl.shape),
            _resident(wo.shape), _resident(bo.shape),
        ]
        out_specs = pl.BlockSpec((out_f, tb), lambda i: (0, i))  # lane-dense output

        return pl.pallas_call(
            functools.partial(_mfn_kernel, L, F, H),
            out_shape=jax.ShapeDtypeStruct((out_f, n_pad), jnp.float32),
            grid_spec=pltpu.PrefetchScalarGridSpec(
                num_scalar_prefetch=0,
                grid=grid,
                in_specs=in_specs,
                out_specs=out_specs,
            ),
            compiler_params=pltpu.CompilerParams(
                dimension_semantics=("parallel",),
                vmem_limit_bytes=vmem_limit),
            cost_estimate=pl.CostEstimate(
                flops=int(flops),
                transcendentals=int(transcendentals),
                bytes_accessed=int(bytes_accessed)),
        )

    args = (x_aug, wxh, wt, bt, wl, bl, wo, bo)
    try:
        out_t = _build_call(True)(*args)
    except Exception:
        # pl.Buffered(1) not accepted on this jax build -> default double buffering
        out_t = _build_call(False)(*args)

    return out_t.T[:N]   # back to (N, out_features)


# ------------------------- Parameter initialization ------------------------ #
def init_params(key, in_features, out_features, hidden_features,
                num_hidden_layers, num_freq):
    """PyTorch-Linear-like init; weights kept in PyTorch (out, in) layout."""
    def linear(key, fan_in, fan_out):
        bound = 1.0 / math.sqrt(fan_in)
        kw, kb = jax.random.split(key)
        w = jax.random.uniform(kw, (fan_out, fan_in), jnp.float32, -bound, bound)
        b = jax.random.uniform(kb, (fan_out,), jnp.float32, -bound, bound)
        return w, b

    L = num_hidden_layers - 1
    keys = jax.random.split(key, 5 + max(L, 1))
    f_w, f_b = linear(keys[0], in_features, num_freq)
    t1_w, t1_b = linear(keys[1], 2 * num_freq, hidden_features)
    t2_w, t2_b = linear(keys[2], 2 * num_freq, hidden_features)
    h1_w, h1_b = linear(keys[3], in_features, hidden_features)
    out_w, out_b = linear(keys[4], hidden_features, out_features)

    if L > 0:
        ws, bs = zip(*[linear(keys[5 + l], hidden_features, hidden_features)
                       for l in range(L)])
        layers_w = jnp.stack(ws, axis=0)
        layers_b = jnp.stack(bs, axis=0)
    else:
        layers_w = jnp.zeros((0, hidden_features, hidden_features), jnp.float32)
        layers_b = jnp.zeros((0, hidden_features), jnp.float32)

    return dict(f_w=f_w, f_b=f_b, t1_w=t1_w, t1_b=t1_b, t2_w=t2_w, t2_b=t2_b,
                h1_w=h1_w, h1_b=h1_b, layers_w=layers_w, layers_b=layers_b,
                out_w=out_w, out_b=out_b)


# ------------------------- Pure-JAX reference ------------------------------ #
def reference_forward(x, p):
    f = x @ p["f_w"].T + p["f_b"]
    enc = jnp.concatenate([jnp.sin(2 * math.pi * f), jnp.cos(2 * math.pi * f)], -1)
    T1 = jax.nn.sigmoid(enc @ p["t1_w"].T + p["t1_b"])
    T2 = jax.nn.sigmoid(enc @ p["t2_w"].T + p["t2_b"])
    Hh = jax.nn.sigmoid(x @ p["h1_w"].T + p["h1_b"])
    for l in range(p["layers_w"].shape[0]):
        Z = jax.nn.sigmoid(Hh @ p["layers_w"][l].T + p["layers_b"][l])
        Hh = (1 - Z) * T1 + Z * T2
    return Hh @ p["out_w"].T + p["out_b"]


if __name__ == "__main__":
    # Small shapes consistent with the module's forward (x: (batch, in_features)).
    batch = 8
    in_features = 4
    out_features = 3
    hidden_features = 32
    num_hidden_layers = 3   # -> 2 inner gated layers
    num_freq = 16

    key = jax.random.PRNGKey(0)
    kx, kp = jax.random.split(key)
    x = jax.random.normal(kx, (batch, in_features), jnp.float32)
    params = init_params(kp, in_features, out_features, hidden_features,
                         num_hidden_layers, num_freq)

    out = modified_fourier_net(x, params)
    out = jax.block_until_ready(out)

    ref = jax.block_until_ready(reference_forward(x, params))
    # Tolerance slightly relaxed vs pure f32 replay: 2*pi / 0.5 scale folding and
    # bias-row folding reassociate the f32 math (still far below any real bug).
    np.testing.assert_allclose(np.asarray(out), np.asarray(ref),
                               rtol=1e-4, atol=1e-4)

    print("KERNEL_OK")
</pallas_src>

<mosaic_0001>
module attributes {stable_mosaic.version = 11 : i64} {
  func.func @_mfn_kernel(%arg0: i32, %arg1: memref<5x128xf32, #tpu.memory_space<vmem>>, %arg2: memref<48x5xf32, #tpu.memory_space<vmem>>, %arg3: memref<64x32xf32, #tpu.memory_space<vmem>>, %arg4: memref<64x1xf32, #tpu.memory_space<vmem>>, %arg5: memref<2x32x32xf32, #tpu.memory_space<vmem>>, %arg6: memref<2x32x1xf32, #tpu.memory_space<vmem>>, %arg7: memref<3x32xf32, #tpu.memory_space<vmem>>, %arg8: memref<3x1xf32, #tpu.memory_space<vmem>>, %arg9: memref<3x128xf32, #tpu.memory_space<vmem>>) attributes {dimension_semantics = [#tpu.dimension_semantics<parallel>], iteration_bounds = array<i64: 1>, scalar_prefetch = 0 : i64, scratch_operands = 0 : i64, tpu.core_type = #tpu.core_type<tc>, window_params = [{transform_indices = @transform_0, window_bounds = array<i64: 5, 128>}, {pipeline_mode = #tpu.pipeline_mode<synchronous>, transform_indices = @transform_1, window_bounds = array<i64: 48, 5>}, {pipeline_mode = #tpu.pipeline_mode<synchronous>, transform_indices = @transform_2, window_bounds = array<i64: 64, 32>}, {pipeline_mode = #tpu.pipeline_mode<synchronous>, transform_indices = @transform_3, window_bounds = array<i64: 64, 1>}, {pipeline_mode = #tpu.pipeline_mode<synchronous>, transform_indices = @transform_4, window_bounds = array<i64: 2, 32, 32>}, {pipeline_mode = #tpu.pipeline_mode<synchronous>, transform_indices = @transform_5, window_bounds = array<i64: 2, 32, 1>}, {pipeline_mode = #tpu.pipeline_mode<synchronous>, transform_indices = @transform_6, window_bounds = array<i64: 3, 32>}, {pipeline_mode = #tpu.pipeline_mode<synchronous>, transform_indices = @transform_7, window_bounds = array<i64: 3, 1>}, {transform_indices = @transform_8, window_bounds = array<i64: 3, 128>}]} {
    %c0 = arith.constant 0 : index
    %c0_0 = arith.constant 0 : index
    %0 = vector.load %arg1[%c0, %c0_0] : memref<5x128xf32, #tpu.memory_space<vmem>>, vector<5x128xf32>
    %c0_1 = arith.constant 0 : index
    %c0_2 = arith.constant 0 : index
    %1 = vector.load %arg2[%c0_1, %c0_2] : memref<48x5xf32, #tpu.memory_space<vmem>>, vector<48x5xf32>
    %cst = arith.constant dense<0.000000e+00> : vector<48x128xf32>
    %2 = tpu.matmul %1, %0, %cst {dimension_numbers = #tpu.dot_dimension_numbers<[1], [0], [0], [1], [0, 0, 1, 1], [], []>} : vector<48x5xf32>, vector<5x128xf32>, vector<48x128xf32> -> vector<48x128xf32>
    %3 = vector.extract_strided_slice %2 {offsets = [0, 0], sizes = [16, 128], strides = [1, 1]} : vector<48x128xf32> to vector<16x128xf32>
    %4 = vector.extract_strided_slice %2 {offsets = [16, 0], sizes = [32, 128], strides = [1, 1]} : vector<48x128xf32> to vector<32x128xf32>
    %5 = math.sin %3 : vector<16x128xf32>
    %6 = math.cos %3 : vector<16x128xf32>
    %7 = tpu.concatenate %5, %6 in 0 : vector<16x128xf32>, vector<16x128xf32> -> vector<32x128xf32>
    %c0_3 = arith.constant 0 : index
    %c0_4 = arith.constant 0 : index
    %8 = vector.load %arg3[%c0_3, %c0_4] : memref<64x32xf32, #tpu.memory_space<vmem>>, vector<64x32xf32>
    %cst_5 = arith.constant dense<0.000000e+00> : vector<64x128xf32>
    %9 = tpu.matmul %8, %7, %cst_5 {dimension_numbers = #tpu.dot_dimension_numbers<[1], [0], [0], [1], [0, 0, 1, 1], [], []>} : vector<64x32xf32>, vector<32x128xf32>, vector<64x128xf32> -> vector<64x128xf32>
    %c0_6 = arith.constant 0 : index
    %c0_7 = arith.constant 0 : index
    %10 = vector.load %arg4[%c0_6, %c0_7] : memref<64x1xf32, #tpu.memory_space<vmem>>, vector<64x1xf32>
    %11 = vector.broadcast %10 : vector<64x1xf32> to vector<64x128xf32>
    %12 = arith.addf %9, %11 : vector<64x128xf32>
    %13 = math.tanh %12 : vector<64x128xf32>
    %cst_8 = arith.constant 1.000000e+00 : f32
    %14 = vector.broadcast %cst_8 : f32 to vector<64x128xf32>
    %15 = arith.addf %13, %14 : vector<64x128xf32>
    %cst_9 = arith.constant 5.000000e-01 : f32
    %16 = vector.broadcast %cst_9 : f32 to vector<64x128xf32>
    %17 = arith.mulf %16, %15 : vector<64x128xf32>
    %18 = vector.extract_strided_slice %17 {offsets = [0, 0], sizes = [32, 128], strides = [1, 1]} : vector<64x128xf32> to vector<32x128xf32>
    %19 = vector.extract_strided_slice %17 {offsets = [32, 0], sizes = [32, 128], strides = [1, 1]} : vector<64x128xf32> to vector<32x128xf32>
    %20 = arith.subf %19, %18 : vector<32x128xf32>
    %21 = math.tanh %4 : vector<32x128xf32>
    %cst_10 = arith.constant 1.000000e+00 : f32
    %22 = vector.broadcast %cst_10 : f32 to vector<32x128xf32>
    %23 = arith.addf %21, %22 : vector<32x128xf32>
    %cst_11 = arith.constant 5.000000e-01 : f32
    %24 = vector.broadcast %cst_11 : f32 to vector<32x128xf32>
    %25 = arith.mulf %24, %23 : vector<32x128xf32>
    %c0_12 = arith.constant 0 : index
    %c0_13 = arith.constant 0 : index
    %c0_14 = arith.constant 0 : index
    %26 = vector.load %arg5[%c0_12, %c0_13, %c0_14] : memref<2x32x32xf32, #tpu.memory_space<vmem>>, vector<1x32x32xf32>
    %27 = vector.shape_cast %26 : vector<1x32x32xf32> to vector<32x32xf32>
    %c0_15 = arith.constant 0 : index
    %c0_16 = arith.constant 0 : index
    %c0_17 = arith.constant 0 : index
    %28 = vector.load %arg6[%c0_15, %c0_16, %c0_17] : memref<2x32x1xf32, #tpu.memory_space<vmem>>, vector<1x32x1xf32>
    %29 = vector.shape_cast %28 : vector<1x32x1xf32> to vector<32x1xf32>
    %cst_18 = arith.constant dense<0.000000e+00> : vector<32x128xf32>
    %30 = tpu.matmul %27, %25, %cst_18 {dimension_numbers = #tpu.dot_dimension_numbers<[1], [0], [0], [1], [0, 0, 1, 1], [], []>} : vector<32x32xf32>, vector<32x128xf32>, vector<32x128xf32> -> vector<32x128xf32>
    %31 = vector.broadcast %29 : vector<32x1xf32> to vector<32x128xf32>
    %32 = arith.addf %30, %31 : vector<32x128xf32>
    %33 = math.tanh %32 : vector<32x128xf32>
    %cst_19 = arith.constant 1.000000e+00 : f32
    %34 = vector.broadcast %cst_19 : f32 to vector<32x128xf32>
    %35 = arith.addf %33, %34 : vector<32x128xf32>
    %cst_20 = arith.constant 5.000000e-01 : f32
    %36 = vector.broadcast %cst_20 : f32 to vector<32x128xf32>
    %37 = arith.mulf %36, %35 : vector<32x128xf32>
    %38 = arith.mulf %37, %20 : vector<32x128xf32>
    %39 = arith.addf %18, %38 : vector<32x128xf32>
    %c1 = arith.constant 1 : index
    %c0_21 = arith.constant 0 : index
    %c0_22 = arith.constant 0 : index
    %40 = vector.load %arg5[%c1, %c0_21, %c0_22] : memref<2x32x32xf32, #tpu.memory_space<vmem>>, vector<1x32x32xf32>
    %41 = vector.shape_cast %40 : vector<1x32x32xf32> to vector<32x32xf32>
    %c1_23 = arith.constant 1 : index
    %c0_24 = arith.constant 0 : index
    %c0_25 = arith.constant 0 : index
    %42 = vector.load %arg6[%c1_23, %c0_24, %c0_25] : memref<2x32x1xf32, #tpu.memory_space<vmem>>, vector<1x32x1xf32>
    %43 = vector.shape_cast %42 : vector<1x32x1xf32> to vector<32x1xf32>
    %cst_26 = arith.constant dense<0.000000e+00> : vector<32x128xf32>
    %44 = tpu.matmul %41, %39, %cst_26 {dimension_numbers = #tpu.dot_dimension_numbers<[1], [0], [0], [1], [0, 0, 1, 1], [], []>} : vector<32x32xf32>, vector<32x128xf32>, vector<32x128xf32> -> vector<32x128xf32>
    %45 = vector.broadcast %43 : vector<32x1xf32> to vector<32x128xf32>
    %46 = arith.addf %44, %45 : vector<32x128xf32>
    %47 = math.tanh %46 : vector<32x128xf32>
    %cst_27 = arith.constant 1.000000e+00 : f32
    %48 = vector.broadcast %cst_27 : f32 to vector<32x128xf32>
    %49 = arith.addf %47, %48 : vector<32x128xf32>
    %cst_28 = arith.constant 5.000000e-01 : f32
    %50 = vector.broadcast %cst_28 : f32 to vector<32x128xf32>
    %51 = arith.mulf %50, %49 : vector<32x128xf32>
    %52 = arith.mulf %51, %20 : vector<32x128xf32>
    %53 = arith.addf %18, %52 : vector<32x128xf32>
    %c0_29 = arith.constant 0 : index
    %c0_30 = arith.constant 0 : index
    %54 = vector.load %arg7[%c0_29, %c0_30] : memref<3x32xf32, #tpu.memory_space<vmem>>, vector<3x32xf32>
    %cst_31 = arith.constant dense<0.000000e+00> : vector<3x128xf32>
    %55 = tpu.matmul %54, %53, %cst_31 {dimension_numbers = #tpu.dot_dimension_numbers<[1], [0], [0], [1], [0, 0, 1, 1], [], []>} : vector<3x32xf32>, vector<32x128xf32>, vector<3x128xf32> -> vector<3x128xf32>
    %c0_32 = arith.constant 0 : index
    %c0_33 = arith.constant 0 : index
    %56 = vector.load %arg8[%c0_32, %c0_33] : memref<3x1xf32, #tpu.memory_space<vmem>>, vector<3x1xf32>
    %57 = vector.broadcast %56 : vector<3x1xf32> to vector<3x128xf32>
    %58 = arith.addf %55, %57 : vector<3x128xf32>
    %c0_34 = arith.constant 0 : index
    %c0_35 = arith.constant 0 : index
    %59 = vector.load %arg9[%c0_34, %c0_35] : memref<3x128xf32, #tpu.memory_space<vmem>>, vector<3x128xf32>
    tpu.vector_store %arg9[%c0_34, %c0_35], %58 {strides = array<i32>} : memref<3x128xf32, #tpu.memory_space<vmem>>, vector<3x128xf32>,
    return
  }
  func.func @transform_0(%arg0: i32) -> (i32, i32) {
    %c0_i32 = arith.constant 0 : i32
    %c0_i32_0 = arith.constant 0 : i32
    return %c0_i32, %arg0 : i32, i32
  }
  func.func @transform_1(%arg0: i32) -> (i32, i32) {
    %c0_i32 = arith.constant 0 : i32
    %c0_i32_0 = arith.constant 0 : i32
    %c0_i32_1 = arith.constant 0 : i32
    return %c0_i32, %c0_i32_0 : i32, i32
  }
  func.func @transform_2(%arg0: i32) -> (i32, i32) {
    %c0_i32 = arith.constant 0 : i32
    %c0_i32_0 = arith.constant 0 : i32
    %c0_i32_1 = arith.constant 0 : i32
    return %c0_i32, %c0_i32_0 : i32, i32
  }
  func.func @transform_3(%arg0: i32) -> (i32, i32) {
    %c0_i32 = arith.constant 0 : i32
    %c0_i32_0 = arith.constant 0 : i32
    %c0_i32_1 = arith.constant 0 : i32
    return %c0_i32, %c0_i32_0 : i32, i32
  }
  func.func @transform_4(%arg0: i32) -> (i32, i32, i32) {
    %c0_i32 = arith.constant 0 : i32
    %c0_i32_0 = arith.constant 0 : i32
    %c0_i32_1 = arith.constant 0 : i32
    %c0_i32_2 = arith.constant 0 : i32
    return %c0_i32, %c0_i32_0, %c0_i32_1 : i32, i32, i32
  }
  func.func @transform_5(%arg0: i32) -> (i32, i32, i32) {
    %c0_i32 = arith.constant 0 : i32
    %c0_i32_0 = arith.constant 0 : i32
    %c0_i32_1 = arith.constant 0 : i32
    %c0_i32_2 = arith.constant 0 : i32
    return %c0_i32, %c0_i32_0, %c0_i32_1 : i32, i32, i32
  }
  func.func @transform_6(%arg0: i32) -> (i32, i32) {
    %c0_i32 = arith.constant 0 : i32
    %c0_i32_0 = arith.constant 0 : i32
    %c0_i32_1 = arith.constant 0 : i32
    return %c0_i32, %c0_i32_0 : i32, i32
  }
  func.func @transform_7(%arg0: i32) -> (i32, i32) {
    %c0_i32 = arith.constant 0 : i32
    %c0_i32_0 = arith.constant 0 : i32
    %c0_i32_1 = arith.constant 0 : i32
    return %c0_i32, %c0_i32_0 : i32, i32
  }
  func.func @transform_8(%arg0: i32) -> (i32, i32) {
    %c0_i32 = arith.constant 0 : i32
    %c0_i32_0 = arith.constant 0 : i32
    return %c0_i32, %arg0 : i32, i32
  }
}

module attributes {stable_mosaic.version = 11 : i64} {
  func.func @_mfn_kernel(%arg0: i32, %arg1: memref<5x128xf32, #tpu.memory_space<vmem>>, %arg2: memref<48x5xf32, #tpu.memory_space<vmem>>, %arg3: memref<64x32xf32, #tpu.memory_space<vmem>>, %arg4: memref<64x1xf32, #tpu.memory_space<vmem>>, %arg5: memref<2x32x32xf32, #tpu.memory_space<vmem>>, %arg6: memref<2x32x1xf32, #tpu.memory_space<vmem>>, %arg7: memref<3x32xf32, #tpu.memory_space<vmem>>, %arg8: memref<3x1xf32, #tpu.memory_space<vmem>>, %arg9: memref<3x128xf32, #tpu.memory_space<vmem>>) attributes {dimension_semantics = [#tpu.dimension_semantics<parallel>], iteration_bounds = array<i64: 1>, scalar_prefetch = 0 : i64, scratch_operands = 0 : i64, tpu.core_type = #tpu.core_type<tc>, window_params = [{transform_indices = @transform_0, window_bounds = array<i64: 5, 128>}, {pipeline_mode = #tpu.pipeline_mode<synchronous>, transform_indices = @transform_1, window_bounds = array<i64: 48, 5>}, {pipeline_mode = #tpu.pipeline_mode<synchronous>, transform_indices = @transform_2, window_bounds = array<i64: 64, 32>}, {pipeline_mode = #tpu.pipeline_mode<synchronous>, transform_indices = @transform_3, window_bounds = array<i64: 64, 1>}, {pipeline_mode = #tpu.pipeline_mode<synchronous>, transform_indices = @transform_4, window_bounds = array<i64: 2, 32, 32>}, {pipeline_mode = #tpu.pipeline_mode<synchronous>, transform_indices = @transform_5, window_bounds = array<i64: 2, 32, 1>}, {pipeline_mode = #tpu.pipeline_mode<synchronous>, transform_indices = @transform_6, window_bounds = array<i64: 3, 32>}, {pipeline_mode = #tpu.pipeline_mode<synchronous>, transform_indices = @transform_7, window_bounds = array<i64: 3, 1>}, {transform_indices = @transform_8, window_bounds = array<i64: 3, 128>}]} {
    %c0 = arith.constant 0 : index
    %c0_0 = arith.constant 0 : index
    %0 = vector.load %arg1[%c0, %c0_0] : memref<5x128xf32, #tpu.memory_space<vmem>>, vector<5x128xf32>
    %c0_1 = arith.constant 0 : index
    %c0_2 = arith.constant 0 : index
    %1 = vector.load %arg2[%c0_1, %c0_2] : memref<48x5xf32, #tpu.memory_space<vmem>>, vector<48x5xf32>
    %cst = arith.constant dense<0.000000e+00> : vector<48x128xf32>
    %2 = tpu.matmul %1, %0, %cst {dimension_numbers = #tpu.dot_dimension_numbers<[1], [0], [0], [1], [0, 0, 1, 1], [], []>} : vector<48x5xf32>, vector<5x128xf32>, vector<48x128xf32> -> vector<48x128xf32>
    %3 = vector.extract_strided_slice %2 {offsets = [0, 0], sizes = [16, 128], strides = [1, 1]} : vector<48x128xf32> to vector<16x128xf32>
    %4 = vector.extract_strided_slice %2 {offsets = [16, 0], sizes = [32, 128], strides = [1, 1]} : vector<48x128xf32> to vector<32x128xf32>
    %5 = math.sin %3 : vector<16x128xf32>
    %6 = math.cos %3 : vector<16x128xf32>
    %7 = tpu.concatenate %5, %6 in 0 : vector<16x128xf32>, vector<16x128xf32> -> vector<32x128xf32>
    %c0_3 = arith.constant 0 : index
    %c0_4 = arith.constant 0 : index
    %8 = vector.load %arg3[%c0_3, %c0_4] : memref<64x32xf32, #tpu.memory_space<vmem>>, vector<64x32xf32>
    %cst_5 = arith.constant dense<0.000000e+00> : vector<64x128xf32>
    %9 = tpu.matmul %8, %7, %cst_5 {dimension_numbers = #tpu.dot_dimension_numbers<[1], [0], [0], [1], [0, 0, 1, 1], [], []>} : vector<64x32xf32>, vector<32x128xf32>, vector<64x128xf32> -> vector<64x128xf32>
    %c0_6 = arith.constant 0 : index
    %c0_7 = arith.constant 0 : index
    %10 = vector.load %arg4[%c0_6, %c0_7] : memref<64x1xf32, #tpu.memory_space<vmem>>, vector<64x1xf32>
    %11 = vector.broadcast %10 : vector<64x1xf32> to vector<64x128xf32>
    %12 = arith.addf %9, %11 : vector<64x128xf32>
    %13 = math.tanh %12 : vector<64x128xf32>
    %cst_8 = arith.constant 1.000000e+00 : f32
    %14 = vector.broadcast %cst_8 : f32 to vector<64x128xf32>
    %15 = arith.addf %13, %14 : vector<64x128xf32>
    %cst_9 = arith.constant 5.000000e-01 : f32
    %16 = vector.broadcast %cst_9 : f32 to vector<64x128xf32>
    %17 = arith.mulf %16, %15 : vector<64x128xf32>
    %18 = vector.extract_strided_slice %17 {offsets = [0, 0], sizes = [32, 128], strides = [1, 1]} : vector<64x128xf32> to vector<32x128xf32>
    %19 = vector.extract_strided_slice %17 {offsets = [32, 0], sizes = [32, 128], strides = [1, 1]} : vector<64x128xf32> to vector<32x128xf32>
    %20 = arith.subf %19, %18 : vector<32x128xf32>
    %21 = math.tanh %4 : vector<32x128xf32>
    %cst_10 = arith.constant 1.000000e+00 : f32
    %22 = vector.broadcast %cst_10 : f32 to vector<32x128xf32>
    %23 = arith.addf %21, %22 : vector<32x128xf32>
    %cst_11 = arith.constant 5.000000e-01 : f32
    %24 = vector.broadcast %cst_11 : f32 to vector<32x128xf32>
    %25 = arith.mulf %24, %23 : vector<32x128xf32>
    %c0_12 = arith.constant 0 : index
    %c0_13 = arith.constant 0 : index
    %c0_14 = arith.constant 0 : index
    %26 = vector.load %arg5[%c0_12, %c0_13, %c0_14] : memref<2x32x32xf32, #tpu.memory_space<vmem>>, vector<1x32x32xf32>
    %27 = vector.shape_cast %26 : vector<1x32x32xf32> to vector<32x32xf32>
    %c0_15 = arith.constant 0 : index
    %c0_16 = arith.constant 0 : index
    %c0_17 = arith.constant 0 : index
    %28 = vector.load %arg6[%c0_15, %c0_16, %c0_17] : memref<2x32x1xf32, #tpu.memory_space<vmem>>, vector<1x32x1xf32>
    %29 = vector.shape_cast %28 : vector<1x32x1xf32> to vector<32x1xf32>
    %cst_18 = arith.constant dense<0.000000e+00> : vector<32x128xf32>
    %30 = tpu.matmul %27, %25, %cst_18 {dimension_numbers = #tpu.dot_dimension_numbers<[1], [0], [0], [1], [0, 0, 1, 1], [], []>} : vector<32x32xf32>, vector<32x128xf32>, vector<32x128xf32> -> vector<32x128xf32>
    %31 = vector.broadcast %29 : vector<32x1xf32> to vector<32x128xf32>
    %32 = arith.addf %30, %31 : vector<32x128xf32>
    %33 = math.tanh %32 : vector<32x128xf32>
    %cst_19 = arith.constant 1.000000e+00 : f32
    %34 = vector.broadcast %cst_19 : f32 to vector<32x128xf32>
    %35 = arith.addf %33, %34 : vector<32x128xf32>
    %cst_20 = arith.constant 5.000000e-01 : f32
    %36 = vector.broadcast %cst_20 : f32 to vector<32x128xf32>
    %37 = arith.mulf %36, %35 : vector<32x128xf32>
    %38 = arith.mulf %37, %20 : vector<32x128xf32>
    %39 = arith.addf %18, %38 : vector<32x128xf32>
    %c1 = arith.constant 1 : index
    %c0_21 = arith.constant 0 : index
    %c0_22 = arith.constant 0 : index
    %40 = vector.load %arg5[%c1, %c0_21, %c0_22] : memref<2x32x32xf32, #tpu.memory_space<vmem>>, vector<1x32x32xf32>
    %41 = vector.shape_cast %40 : vector<1x32x32xf32> to vector<32x32xf32>
    %c1_23 = arith.constant 1 : index
    %c0_24 = arith.constant 0 : index
    %c0_25 = arith.constant 0 : index
    %42 = vector.load %arg6[%c1_23, %c0_24, %c0_25] : memref<2x32x1xf32, #tpu.memory_space<vmem>>, vector<1x32x1xf32>
    %43 = vector.shape_cast %42 : vector<1x32x1xf32> to vector<32x1xf32>
    %cst_26 = arith.constant dense<0.000000e+00> : vector<32x128xf32>
    %44 = tpu.matmul %41, %39, %cst_26 {dimension_numbers = #tpu.dot_dimension_numbers<[1], [0], [0], [1], [0, 0, 1, 1], [], []>} : vector<32x32xf32>, vector<32x128xf32>, vector<32x128xf32> -> vector<32x128xf32>
    %45 = vector.broadcast %43 : vector<32x1xf32> to vector<32x128xf32>
    %46 = arith.addf %44, %45 : vector<32x128xf32>
    %47 = math.tanh %46 : vector<32x128xf32>
    %cst_27 = arith.constant 1.000000e+00 : f32
    %48 = vector.broadcast %cst_27 : f32 to vector<32x128xf32>
    %49 = arith.addf %47, %48 : vector<32x128xf32>
    %cst_28 = arith.constant 5.000000e-01 : f32
    %50 = vector.broadcast %cst_28 : f32 to vector<32x128xf32>
    %51 = arith.mulf %50, %49 : vector<32x128xf32>
    %52 = arith.mulf %51, %20 : vector<32x128xf32>
    %53 = arith.addf %18, %52 : vector<32x128xf32>
    %c0_29 = arith.constant 0 : index
    %c0_30 = arith.constant 0 : index
    %54 = vector.load %arg7[%c0_29, %c0_30] : memref<3x32xf32, #tpu.memory_space<vmem>>, vector<3x32xf32>
    %cst_31 = arith.constant dense<0.000000e+00> : vector<3x128xf32>
    %55 = tpu.matmul %54, %53, %cst_31 {dimension_numbers = #tpu.dot_dimension_numbers<[1], [0], [0], [1], [0, 0, 1, 1], [], []>} : vector<3x32xf32>, vector<32x128xf32>, vector<3x128xf32> -> vector<3x128xf32>
    %c0_32 = arith.constant 0 : index
    %c0_33 = arith.constant 0 : index
    %56 = vector.load %arg8[%c0_32, %c0_33] : memref<3x1xf32, #tpu.memory_space<vmem>>, vector<3x1xf32>
    %57 = vector.broadcast %56 : vector<3x1xf32> to vector<3x128xf32>
    %58 = arith.addf %55, %57 : vector<3x128xf32>
    %c0_34 = arith.constant 0 : index
    %c0_35 = arith.constant 0 : index
    %59 = vector.load %arg9[%c0_34, %c0_35] : memref<3x128xf32, #tpu.memory_space<vmem>>, vector<3x128xf32>
    tpu.vector_store %arg9[%c0_34, %c0_35], %58 {strides = array<i32>} : memref<3x128xf32, #tpu.memory_space<vmem>>, vector<3x128xf32>,
    return
  }
  func.func @transform_0(%arg0: i32) -> (i32, i32) {
    %c0_i32 = arith.constant 0 : i32
    %c0_i32_0 = arith.constant 0 : i32
    return %c0_i32, %arg0 : i32, i32
  }
  func.func @transform_1(%arg0: i32) -> (i32, i32) {
    %c0_i32 = arith.constant 0 : i32
    %c0_i32_0 = arith.constant 0 : i32
    %c0_i32_1 = arith.constant 0 : i32
    return %c0_i32, %c0_i32_0 : i32, i32
  }
  func.func @transform_2(%arg0: i32) -> (i32, i32) {
    %c0_i32 = arith.constant 0 : i32
    %c0_i32_0 = arith.constant 0 : i32
    %c0_i32_1 = arith.constant 0 : i32
    return %c0_i32, %c0_i32_0 : i32, i32
  }
  func.func @transform_3(%arg0: i32) -> (i32, i32) {
    %c0_i32 = arith.constant 0 : i32
    %c0_i32_0 = arith.constant 0 : i32
    %c0_i32_1 = arith.constant 0 : i32
    return %c0_i32, %c0_i32_0 : i32, i32
  }
  func.func @transform_4(%arg0: i32) -> (i32, i32, i32) {
    %c0_i32 = arith.constant 0 : i32
    %c0_i32_0 = arith.constant 0 : i32
    %c0_i32_1 = arith.constant 0 : i32
    %c0_i32_2 = arith.constant 0 : i32
    return %c0_i32, %c0_i32_0, %c0_i32_1 : i32, i32, i32
  }
  func.func @transform_5(%arg0: i32) -> (i32, i32, i32) {
    %c0_i32 = arith.constant 0 : i32
    %c0_i32_0 = arith.constant 0 : i32
    %c0_i32_1 = arith.constant 0 : i32
    %c0_i32_2 = arith.constant 0 : i32
    return %c0_i32, %c0_i32_0, %c0_i32_1 : i32, i32, i32
  }
  func.func @transform_6(%arg0: i32) -> (i32, i32) {
    %c0_i32 = arith.constant 0 : i32
    %c0_i32_0 = arith.constant 0 : i32
    %c0_i32_1 = arith.constant 0 : i32
    return %c0_i32, %c0_i32_0 : i32, i32
  }
  func.func @transform_7(%arg0: i32) -> (i32, i32) {
    %c0_i32 = arith.constant 0 : i32
    %c0_i32_0 = arith.constant 0 : i32
    %c0_i32_1 = arith.constant 0 : i32
    return %c0_i32, %c0_i32_0 : i32, i32
  }
  func.func @transform_8(%arg0: i32) -> (i32, i32) {
    %c0_i32 = arith.constant 0 : i32
    %c0_i32_0 = arith.constant 0 : i32
    return %c0_i32, %arg0 : i32, i32
  }
}

</mosaic_0001>

<bundles_post_ra>
// kernel: tpu_custom_call.1
= control target key start
LH: loop header
LB: loop body
LE: loop exit
PB: predicated region body
PF: predicated region fallthrough
CT: control target
= control target key end

     0   :  { %vm56_vm0 = vcmask 1044480   ;;  %vm37_vm1 = vcmask 39936   ;;  %s1804_s0 = inlined_call_operand.vmem [shape: f32[5,128], index: 0, kind: input, shape index: {}]   ;;  %s1805_s1 = inlined_call_operand.vmem [shape: f32[48,5], index: 1, kind: input, shape index: {}]   ;;  %s1806_s2 = inlined_call_operand.vmem [shape: f32[64,32], index: 2, kind: input, shape index: {}]   ;;  %s1807_s3 = inlined_call_operand.vmem [shape: f32[64,1], index: 3, kind: input, shape index: {}]   ;;  %s1808_s4 = inlined_call_operand.vmem [shape: f32[2,32,32], index: 4, kind: input, shape index: {}]   ;;  %s1809_s5 = inlined_call_operand.vmem [shape: f32[2,32,1], index: 5, kind: input, shape index: {}]   ;;  %s1810_s6 = inlined_call_operand.vmem [shape: f32[3,32], index: 6, kind: input, shape index: {}]   ;;  %s1811_s7 = inlined_call_operand.vmem [shape: f32[3,1], index: 7, kind: input, shape index: {}]   ;;  %s1812_s8 = inlined_call_operand.hbm [shape: f32[3,128], index: 8, kind: output, shape index: {}]  }
   0x1   :  { %v30_v0 = vld [vmem:[%s1804_s0] sm:$0x1f]  ;;  %v32_v2 = vld [vmem:[%s1805_s1 + $0x8] sm:$0xff]  ;;  %v33_v3 = vld [vmem:[%s1805_s1 + $0x10] sm:$0xff] }
   0x2   :  { %v31_v1 = vld [vmem:[%s1805_s1] sm:$0xff]  ;;  %1270 = vmatprep.subr.msk.mxu0 %vm56_vm0, %v30_v0 }
   0x3   :  { %1272 = vmatprep.mubr.msk.f32.mxu0 %vm37_vm1, %v31_v1  ;;  %1271 = vmatpush3.msk.msra.mxu0 %vm56_vm0, %v30_v0 }
   0x4   :  { %13 = vsyncpa [#allocation3], 0  ;;  %1273 = vmatmul.mubr.msk.f32.vlgmr.msra.gmra.mrb[0].mxu0 %vm37_vm1, %v32_v2  ;;  %v34_v4 = vld [vmem:[%s1805_s1 + $0x18] sm:$0xff]  ;;  %v35_v5 = vld [vmem:[%s1805_s1 + $0x20] sm:$0xff]  ;;  %vm625_vm2 = vcmask 261120   ;;  %v1463_v11 = vmov 0  }
   0x5   :  { %1275 = vmatprep.mubr.msk.f32.mxu0 %vm37_vm1, %v33_v3  ;;  %v36_v6 = vld [vmem:[%s1805_s1 + $0x28] sm:$0xff]  ;;  %v795_v7 = vld [vmem:[%s1808_s4] sm:$0xff]  ;;  %1389 = vset.pattern.permute.xlu0 %v1463_v11  ;;  %v579_v16 = vld [vmem:[%s1807_s3 + $0x10] sm:$0xff]  ;;  %v1464_v52 = vmov 683565275   ;;  %s1473_s29 = smov [#allocation2]  }
   0x6   :  { %v569_v8 = vld [vmem:[%s1806_s2] sm:$0xff]  ;;  %1390 = vset.pattern.permute.xlu1 %v1463_v11  ;;  %v578_v12 = vld [vmem:[%s1807_s3 + $0x8] sm:$0xff]  ;;  %v580_v17 = vld [vmem:[%s1807_s3 + $0x18] sm:$0xff]  ;;  %v1465_v54 = vmov 2475754826   ;;  %s1174_s30 = sshll.u32 %s1473_s29, 4  ;;  %s1175_s30 = int_to_ptr.vmem [resolvable:$true] %s1174_s30 }
   0x7   :  { %1289 = vmatprep.mubr.msk.f32.mxu1 %vm625_vm2, %v569_v8  ;;  %v577_v9 = vld [vmem:[%s1807_s3] sm:$0xff]  ;;  %v582_v13 = vld [vmem:[%s1807_s3 + $0x28] sm:$0xff]  ;;  %v583_v22 = vld [vmem:[%s1807_s3 + $0x30] sm:$0xff]  ;;  %v1466_v59 = vmov 2131351028   ;;  %s1439_s9 = scalar_lea.vmem %s1175_s30, 64  ;;  %p1444_p1 = scmp.lt.s32.totalorder %s1175_s30, %s1175_s30 }
   0x8   :  { %1276 = vmatmul.mubr.msk.f32.gmra.mrb[2].mxu0 %vm37_vm1, %v34_v4  ;;  %v581_v10 = vld [vmem:[%s1807_s3 + $0x20] sm:$0xff]  ;;  %587 = vperm.xlu0 %1389, %v577_v9   ;;  %v800_v15 = vld [vmem:[%s1809_s5 + $0x8] sm:$0xff]  ;;  %v584_v23 = vld [vmem:[%s1807_s3 + $0x38] sm:$0xff]  ;;  %v1467_v61 = vmov 2102212464   ;;  %p1440_p0 = scmp.ne.s32.totalorder %s1175_s30, %s1439_s9  ;;  %p1445_p2 = scmp.lt.s32.totalorder %s1439_s9, %s1439_s9 }
   0x9   :  { %1278 = vmatprep.mubr.msk.f32.mxu0 %vm37_vm1, %v35_v5  ;;  %607 = vperm.xlu1 %1390, %v581_v10   ;;  %v799_v14 = vld [vmem:[%s1809_s5] sm:$0xff]  ;;  %v801_v33 = vld [vmem:[%s1809_s5 + $0x10] sm:$0xff]  ;;  %v802_v34 = vld [vmem:[%s1809_s5 + $0x18] sm:$0xff]  ;;  %v1468_v63 = vmov 920167782  }
   0xa   :  { %v1221_v42 = vld [vmem:[%s1809_s5 + $0x20] sm:$0xff]  ;;  %v1222_v43 = vld [vmem:[%s1809_s5 + $0x28] sm:$0xff]  ;;  %v1223_v57 = vld [vmem:[%s1809_s5 + $0x30] sm:$0xff]  ;;  %p1446_p3 = por %p1445_p2, %p1444_p1 }
   0xb   :  { %v1224_v58 = vld [vmem:[%s1809_s5 + $0x38] sm:$0xff] }
   0xc   :  { %1279 = vmatmul.mubr.msk.f32.gmra.mrb[4].mxu0 %vm37_vm1, %v36_v6  ;;  %592 = vperm.xlu0 %1389, %v578_v12   ;;  %v1469_v6 = vmov 1326507024   ;;  %v1088_v12 = vld [vmem:[%s1811_s7] sm:$0x7]  ;;  %p1447_p4 = pnand %p1446_p3, %p1440_p0 }
   0xd   :  { %1309 = vmatprep.mubr.msk.f32.mxu0 %vm625_vm2, %v795_v7  ;;  %612 = vperm.xlu1 %1390, %v582_v13  }
  0x10   :  { %805 = vperm.xlu0 %1389, %v799_v14  }
  0x11   :  { %810 = vperm.xlu1 %1390, %v800_v15  }
  0x14   :  { %597 = vperm.xlu0 %1389, %v579_v16  }
  0x15   :  { %602 = vperm.xlu1 %1390, %v580_v17  }
  0x18   :  { %617 = vperm.xlu0 %1389, %v583_v22  }
  0x19   :  { %622 = vperm.xlu1 %1390, %v584_v23  }
  0x1c   :  { %815 = vperm.xlu0 %1389, %v801_v33  }
  0x1d   :  { %820 = vperm.xlu1 %1390, %v802_v34  }
  0x20   :  { %952 = vperm.xlu0 %1389, %v1221_v42  }
  0x21   :  { %957 = vperm.xlu1 %1390, %v1222_v43  }
  0x24   :  { %962 = vperm.xlu0 %1389, %v1223_v57  }
  0x25   :  { %967 = vperm.xlu1 %1390, %v1224_v58  }
  0x28   :  { %1091 = vperm.xlu0 %1389, %v1088_v12  }
  0xd7   :  { %v1572_v18 = vpop.f32.mrb[0].mxu0 }
  0xd8   :  { %v259_v19 = vand.u32 2147483647, %v1572_v18  ;;  %v262_v20 = vand.u32 2139095040, %v1572_v18  ;;  %v1576_v21 = vpop.f32.mrb[1].mxu0  ;;  %vm261_vm1 = vcmp.lt.s32.totalorder %v1572_v18, 0 }
  0xd9   :  { %v155_v24 = vand.u32 2147483647, %v1576_v21  ;;  %v158_v25 = vand.u32 2139095040, %v1576_v21 }
  0xda   :  { %v263_v26 = vshrl.u32 %v262_v20, 23  ;;  %v266_v27 = vand.u32 8388607, %v259_v19 }
  0xdb   :  { %v159_v28 = vshrl.u32 %v158_v25, 23  ;;  %v162_v29 = vand.u32 8388607, %v155_v24  ;;  %v1277_v30 = vpop.f32.mrb[2].mxu0 }
  0xdc   :  { %v1193_v31 = vadd.s32 4294967169, %v263_v26  ;;  %v136_v32 = vpop.f32.mrb[3].mxu0  ;;  %v267_v37 = vor.u32 8388608, %v266_v27  ;;  %1391 = vtanh.f32 %v1277_v30 }
  0xdd   :  { %v1189_v35 = vadd.s32 4294967169, %v159_v28  ;;  %v163_v38 = vor.u32 8388608, %v162_v29  ;;  %1393 = vtanh.f32 %v136_v32 }
  0xde   :  { %v269_v36 = vadd.s32 1, %v1193_v31  ;;  %v1604_v48 = vshll.u32 %v267_v37, 8 }
  0xdf   :  { %v165_v39 = vadd.s32 1, %v1189_v35  ;;  %v1280_v40 = vpop.f32.mrb[4].mxu0  ;;  %v1608_v50 = vshll.u32 %v163_v38, 8 }
  0xe0   :  { %vm270_vm3 = vcmp.gt.s32.totalorder %v269_v36, 0  ;;  %v146_v41 = vpop.f32.mrb[5].mxu0  ;;  %1395 = vtanh.f32 %v1280_v40 }
  0xe1   :  { %v271_v44 = vsel %vm270_vm3, %v269_v36, 0  ;;  %vm166_vm4 = vcmp.gt.s32.totalorder %v165_v39, 0  ;;  %1397 = vtanh.f32 %v146_v41  ;;  %vm260_vm3 = vcmp.le.f32.partialorder %v259_v19, 0.7853982 }
  0xe2   :  { %v1602_v45 = vshrl.u32 %v271_v44, 5  ;;  %v273_v46 = vand.u32 31, %v271_v44  ;;  %v167_v47 = vsel %vm166_vm4, %v165_v39, 0  ;;  %vm157_vm4 = vcmp.lt.s32.totalorder %v1576_v21, 0 }
  0xe3   :  { %v1606_v49 = vshrl.u32 %v167_v47, 5  ;;  %v1610_v56 = vand.u32 31, %v167_v47 }
  0xe4   :  { %v274_v51 = vsub.s32 32, %v273_v46  ;;  %v276_v53 = vshll.u32 %v1464_v52, %v273_v46  ;;  %v279_v55 = vshll.u32 %v1465_v54, %v273_v46  ;;  %v282_v60 = vshll.u32 %v1466_v59, %v273_v46 }
  0xe5   :  { %v285_v62 = vshll.u32 %v1467_v61, %v273_v46  ;;  %v288_v0 = vshll.u32 %v1468_v63, %v273_v46  ;;  %vm291_vm5 = vcmp.lt.s32.totalorder %v1602_v45, 1  ;;  %vm292_vm6 = vcmp.lt.s32.totalorder %v1602_v45, 2 }
  0xe6   :  { %v277_v1 = vshrl.u32 %v1465_v54, %v274_v51  ;;  %v280_v2 = vshrl.u32 %v1466_v59, %v274_v51  ;;  %v283_v3 = vshrl.u32 %v1467_v61, %v274_v51  ;;  %v275_v4 = vshrl.u32 %v1464_v52, %v274_v51  ;;  %v1392_v16 = vpop.eup %1391 }
  0xe7   :  { %v286_v5 = vshrl.u32 %v1468_v63, %v274_v51  ;;  %v289_v7 = vshrl.u32 %v1469_v6, %v274_v51  ;;  %vm293_vm7 = vcmp.lt.s32.totalorder %v1602_v45, 3  ;;  %v170_v11 = vsub.s32 32, %v1610_v56  ;;  %v1394_v25 = vpop.eup %1393 }
  0xe8   :  { %v278_v8 = vor.u32 %v277_v1, %v276_v53  ;;  %v281_v9 = vor.u32 %v280_v2, %v279_v55  ;;  %v284_v10 = vor.u32 %v283_v3, %v282_v60  ;;  %vm294_vm8 = vcmp.lt.s32.totalorder %v1602_v45, 4 }
  0xe9   :  { %v287_v13 = vor.u32 %v286_v5, %v285_v62  ;;  %v290_v14 = vor.u32 %v289_v7, %v288_v0  ;;  %v172_v15 = vshll.u32 %v1464_v52, %v1610_v56  ;;  %v175_v29 = vshll.u32 %v1465_v54, %v1610_v56 }
  0xea   :  { %v295_v17 = vsel %vm291_vm5, %v275_v4, %v278_v8  ;;  %v296_v20 = vsel %vm294_vm8, %v284_v10, 2102212464  ;;  %v299_v22 = vsel %vm291_vm5, %v278_v8, %v281_v9  ;;  %v303_v23 = vsel %vm291_vm5, %v281_v9, %v284_v10  ;;  %v1396_v30 = vpop.eup %1395 }
  0xeb   :  { %v297_v26 = vsel %vm293_vm7, %v281_v9, %v296_v20  ;;  %v300_v27 = vsel %vm294_vm8, %v287_v13, 920167782  ;;  %v304_v28 = vsel %vm294_vm8, %v290_v14, 1326507024  ;;  %v171_v33 = vshrl.u32 %v1464_v52, %v170_v11  ;;  %v1398_v35 = vpop.eup %1397 }
  0xec   :  { %v301_v31 = vsel %vm293_vm7, %v284_v10, %v300_v27  ;;  %v305_v32 = vsel %vm293_vm7, %v287_v13, %v304_v28  ;;  %v173_v34 = vshrl.u32 %v1465_v54, %v170_v11  ;;  %v298_v36 = vsel %vm292_vm6, %v295_v17, %v297_v26 }
  0xed   :  { %v302_v37 = vsel %vm292_vm6, %v299_v22, %v301_v31  ;;  %v306_v38 = vsel %vm292_vm6, %v303_v23, %v305_v32  ;;  %v176_v39 = vshrl.u32 %v1466_v59, %v170_v11  ;;  %v178_v47 = vshll.u32 %v1466_v59, %v1610_v56 }
  0xee   :  { %v1647_v40 = vmul.u32.u64.low %v1604_v48, %v306_v38  ;;  %v1648_v41 = vmul.u32.u64.high %v1604_v48, %v306_v38, %v1647_v40  ;;  %v1651_v42 = vmul.u32.u64.low %v1604_v48, %v302_v37  ;;  %v1652_v43 = vmul.u32.u64.high %v1604_v48, %v302_v37, %v1651_v42 }
  0xef   :  { %v174_v44 = vor.u32 %v173_v34, %v172_v15  ;;  %v177_v46 = vor.u32 %v176_v39, %v175_v29  ;;  %v179_v51 = vshrl.u32 %v1467_v61, %v170_v11  ;;  %v314_v52 = vmul.u32 %v1604_v48, %v298_v36 }
  0xf0   :  { %v181_v45 = vshll.u32 %v1467_v61, %v1610_v56  ;;  %v182_v53 = vshrl.u32 %v1468_v63, %v170_v11  ;;  %v185_v54 = vshrl.u32 %v1469_v6, %v170_v11  ;;  %v184_v57 = vshll.u32 %v1468_v63, %v1610_v56 }
  0xf1   :  { %v180_v55 = vor.u32 %v179_v51, %v178_v47  ;;  %vm187_vm9 = vcmp.lt.s32.totalorder %v1606_v49, 1  ;;  %vm188_vm10 = vcmp.lt.s32.totalorder %v1606_v49, 2  ;;  %vm316_vm11 = vc.u32 %v1648_v41, %v1651_v42  ;;  %v798_v51 = vld [vmem:[%s1808_s4 + $0x18] sm:$0xff] }
  0xf2   :  { %v317_v58 = vadd.s32 1, %v1652_v43  ;;  %v183_v59 = vor.u32 %v182_v53, %v181_v45  ;;  %vm189_vm12 = vcmp.lt.s32.totalorder %v1606_v49, 3  ;;  %v186_v48 = vor.u32 %v185_v54, %v184_v57 }
  0xf3   :  { %vm190_vm13 = vcmp.lt.s32.totalorder %v1606_v49, 4  ;;  %v191_v60 = vsel %vm187_vm9, %v171_v33, %v174_v44  ;;  %v195_v61 = vsel %vm187_vm9, %v174_v44, %v177_v46  ;;  %v199_v0 = vsel %vm187_vm9, %v177_v46, %v180_v55 }
  0xf4   :  { %v318_v62 = vsel %vm316_vm11, %v317_v58, %v1652_v43  ;;  %v192_v56 = vsel %vm190_vm13, %v180_v55, 2102212464  ;;  %v196_v63 = vsel %vm190_vm13, %v183_v59, 920167782  ;;  %v200_v4 = vsel %vm190_vm13, %v186_v48, 1326507024 }
  0xf5   :  { %v319_v1 = vadd.s32 %v318_v62, %v314_v52  ;;  %v193_v2 = vsel %vm189_vm12, %v177_v46, %v192_v56  ;;  %v197_v3 = vsel %vm189_vm12, %v180_v55, %v196_v63  ;;  %v201_v6 = vsel %vm189_vm12, %v183_v59, %v200_v4  ;;  %v797_v43 = vld [vmem:[%s1808_s4 + $0x10] sm:$0xff] }
  0xf6   :  { %v198_v5 = vsel %vm188_vm10, %v195_v61, %v197_v3  ;;  %v788_v7 = vadd.f32 1.0, %v1392_v16  ;;  %v202_v9 = vsel %vm188_vm10, %v199_v0, %v201_v6  ;;  %v194_v12 = vsel %vm188_vm10, %v191_v60, %v193_v2 }
  0xf7   :  { %v320_v8 = vadd.s32 536870912, %v319_v1  ;;  %v1672_v10 = vmul.u32.u64.low %v1608_v50, %v198_v5  ;;  %v1673_v11 = vmul.u32.u64.high %v1608_v50, %v198_v5, %v1672_v10  ;;  %v787_v20 = vadd.f32 1.0, %v1394_v25 }
  0xf8   :  { %v1678_v13 = vmul.u32.u64.low %v1608_v50, %v202_v9  ;;  %v1679_v14 = vmul.u32.u64.high %v1608_v50, %v202_v9, %v1678_v13  ;;  %v792_v15 = vmul.f32 0.5, %v788_v7  ;;  %v790_v16 = vadd.f32 1.0, %v1396_v30 }
  0xf9   :  { %v1681_v17 = vshrl.u32 %v320_v8, 30  ;;  %v789_v22 = vadd.f32 1.0, %v1398_v35  ;;  %v213_v26 = vadd.s32 1, %v1673_v11  ;;  %v791_v27 = vmul.f32 0.5, %v787_v20 }
  0xfa   :  { %v210_v28 = vmul.u32 %v1608_v50, %v194_v12  ;;  %vm212_vm14 = vc.u32 %v1679_v14, %v1672_v10  ;;  %v794_v49 = vmul.f32 0.5, %v790_v16  ;;  %v796_v50 = vld [vmem:[%s1808_s4 + $0x8] sm:$0xff]  ;;  %v315_v52 = vadd.s32 %v1651_v42, %v1648_v41 }
  0xfb   :  { %v322_v23 = vshll.u32 %v1681_v17, 30  ;;  %v793_v29 = vmul.f32 0.5, %v789_v22  ;;  %v214_v32 = vsel %vm212_vm14, %v213_v26, %v1673_v11  ;;  %v1348_v33 = vpack.c.bf16 %v792_v15, %v791_v27 }
  0xfc   :  { %v215_v34 = vadd.s32 %v214_v32, %v210_v28  ;;  %v345_v11 = vsub.s32 4, %v1681_v17  ;;  %vm156_vm5 = vcmp.le.f32.partialorder %v155_v24, 0.7853982  ;;  %vm351_vm10 = vweird.f32 %v1572_v18 }
  0xfd   :  { %v323_v31 = vsub.s32 %v319_v1, %v322_v23  ;;  %v1352_v36 = vpack.c.bf16 %v794_v49, %v793_v29  ;;  %1349 = vmatprep.subr.bf16.mxu0 %v1348_v33  ;;  %v211_v1 = vadd.s32 %v1672_v10, %v1679_v14 }
  0xfe   :  { %v216_v30 = vadd.s32 536870912, %v215_v34  ;;  %1351 = vmatpush3.bf16.msra.mxu0 %v1348_v33  ;;  %v346_v15 = vsel %vm261_vm1, %v345_v11, %v1681_v17 }
  0xff   :  { %v325_v25 = vsub.s32 0, %v323_v31  ;;  %1353 = vmatprep.subr.bf16.mxu0 %v1352_v36  ;;  %v348_v22 = vsel %vm260_vm3, 0, %v346_v15 }
 0x100   :  { %v217_v37 = vshrl.u32 %v216_v30, 30  ;;  %v352_v28 = vadd.s32 3, %v348_v22  ;;  %v559_v17 = vand.u32 3, %v348_v22 }
 0x101   :  { %v1194_v35 = vmin.u32 %v325_v25, %v323_v31 }
 0x102   :  { %v218_v39 = vshll.u32 %v217_v37, 30  ;;  %1355 = vmatpush3.bf16.msra.mxu0 %v1352_v36  ;;  %v241_v20 = vsub.s32 4, %v217_v37  ;;  %v353_v33 = vand.u32 3, %v352_v28  ;;  %vm561_vm6 = vcmp.eq.s32.totalorder %v559_v17, 0 }
 0x103   :  { %v327_v38 = vclz %v1194_v35  ;;  %vm564_vm7 = vcmp.eq.s32.totalorder %v559_v17, 2  ;;  %vm560_vm12 = vcmp.lt.s32.totalorder %v559_v17, 2 }
 0x104   :  { %v219_v44 = vsub.s32 %v215_v34, %v218_v39  ;;  %v242_v26 = vsel %vm157_vm4, %v241_v20, %v217_v37  ;;  %vm355_vm8 = vcmp.eq.s32.totalorder %v353_v33, 0  ;;  %vm358_vm9 = vcmp.eq.s32.totalorder %v353_v33, 2 }
 0x105   :  { %v1195_v40 = vadd.s32 4294967294, %v327_v38  ;;  %1310 = vmatmul.mubr.msk.f32.vlgmr.msra.gmra.mrb[6].mxu0 %vm625_vm2, %v796_v50  ;;  %v244_v49 = vsel %vm156_vm5, 0, %v242_v26  ;;  %vm354_vm11 = vcmp.lt.s32.totalorder %v353_v33, 2 }
 0x106   :  { %v221_v47 = vsub.s32 0, %v219_v44  ;;  %1312 = vmatprep.mubr.msk.f32.mxu0 %vm625_vm2, %v797_v43  ;;  %v248_v32 = vadd.s32 3, %v244_v49  ;;  %v456_v24 = vand.u32 3, %v244_v49 }
 0x107   :  { %vm1196_vm15 = vcmp.lt.s32.totalorder %v1195_v40, 0 }
 0x108   :  { %v330_v46 = vsel %vm1196_vm15, 0, %v1195_v40  ;;  %v1190_v54 = vmin.u32 %v221_v47, %v219_v44  ;;  %v249_v25 = vand.u32 3, %v248_v32  ;;  %vm457_vm13 = vcmp.lt.s32.totalorder %v456_v24, 2 }
 0x109   :  { %v331_v45 = vsub.s32 32, %v330_v46  ;;  %v335_v53 = vsub.s32 4294967266, %v330_v46  ;;  %v332_v55 = vshll.u32 %v323_v31, %v330_v46  ;;  %1313 = vmatmul.mubr.msk.f32.gmra.mrb[8].mxu0 %vm625_vm2, %v798_v51  ;;  %vm458_vm15 = vcmp.eq.s32.totalorder %v456_v24, 0 }
 0x10a   :  { %v223_v59 = vclz %v1190_v54  ;;  %vm254_vm14 = vcmp.eq.s32.totalorder %v249_v25, 2 }
 0x10b   :  { %v333_v57 = vshrl.u32 %v315_v52, %v331_v45  ;;  %v336_v58 = vadd.s32 127, %v335_v53 }
 0x10c   :  { %v1191_v61 = vadd.s32 4294967294, %v223_v59 }
 0x10d   :  { %v334_v48 = vor.u32 %v333_v57, %v332_v55  ;;  %v337_v60 = vshll.u32 %v336_v58, 23 }
 0x10e   :  { %vm1192_vm0 = vcmp.lt.s32.totalorder %v1191_v61, 0 }
 0x10f   :  { %v338_v62 = vor.u32 4788187, %v337_v60  ;;  %v341_v63 = vcvt.s32.f32 %v334_v48  ;;  %v226_v0 = vsel %vm1192_vm0, 0, %v1191_v61  ;;  %vm461_vm0 = vcmp.eq.s32.totalorder %v456_v24, 2  ;;  %v570_v61 = vld [vmem:[%s1806_s2 + $0x8] sm:$0xff] }
 0x110   :  { %v227_v41 = vsub.s32 32, %v226_v0  ;;  %v231_v42 = vsub.s32 4294967266, %v226_v0  ;;  %v228_v3 = vshll.u32 %v219_v44, %v226_v0  ;;  %v576_v0 = vld [vmem:[%s1806_s2 + $0x38] sm:$0xff] }
 0x111   :  { %v339_v56 = vand.u32 2147483647, %v338_v62  ;;  %v573_v62 = vld [vmem:[%s1806_s2 + $0x20] sm:$0xff] }
 0x112   :  { %v229_v4 = vshrl.u32 %v211_v1, %v227_v41  ;;  %v232_v5 = vadd.s32 127, %v231_v42  ;;  %v1217_v1 = vld [vmem:[%s1808_s4 + $0x20] sm:$0xff] }
 0x113   :  { %v342_v2 = vmul.f32 %v341_v63, %v339_v56  ;;  %v574_v56 = vld [vmem:[%s1806_s2 + $0x28] sm:$0xff]  ;;  %v575_v63 = vld [vmem:[%s1806_s2 + $0x30] sm:$0xff]  ;;  %1323 = vmatprep.mubr.msk.f32.mxu0 %vm625_vm2, %v1217_v1 }
 0x114   :  { %v230_v7 = vor.u32 %v229_v4, %v228_v3  ;;  %v233_v8 = vshll.u32 %v232_v5, 23  ;;  %v608_v4 = vpop.permute.xlu1 %607  ;;  %v588_v5 = vpop.permute.xlu0 %587 }
 0x115   :  { %v343_v6 = vxor.u32 2147483648, %v342_v2 }
 0x116   :  { %v234_v10 = vor.u32 4788187, %v233_v8  ;;  %v237_v14 = vcvt.s32.f32 %v230_v7 }
 0x117   :  { %v344_v9 = vsel %vm261_vm1, %v343_v6, %v342_v2  ;;  %vm250_vm1 = vcmp.lt.s32.totalorder %v249_v25, 2 }
 0x118   :  { %v347_v12 = vsel %vm260_vm3, %v1572_v18, %v344_v9  ;;  %v235_v13 = vand.u32 2147483647, %v234_v10  ;;  %vm251_vm3 = vcmp.eq.s32.totalorder %v249_v25, 0  ;;  %v571_v18 = vld [vmem:[%s1806_s2 + $0x10] sm:$0xff]  ;;  %v613_v6 = vpop.permute.xlu1 %612  ;;  %v593_v7 = vpop.permute.xlu0 %592 }
 0x119   :  { %1399 = vcosq.f32 %v347_v12 }
 0x11a   :  { %1401 = vsinq.f32 %v347_v12  ;;  %v238_v16 = vmul.f32 %v237_v14, %v235_v13 }
 0x11c   :  { %v239_v23 = vxor.u32 2147483648, %v238_v16  ;;  %v811_v8 = vpop.permute.xlu1 %810  ;;  %v806_v9 = vpop.permute.xlu0 %805 }
 0x11e   :  { %v240_v19 = vsel %vm157_vm4, %v239_v23, %v238_v16  ;;  %vm247_vm4 = vweird.f32 %v1576_v21 }
 0x11f   :  { %v243_v27 = vsel %vm156_vm5, %v1576_v21, %v240_v19  ;;  %v572_v21 = vld [vmem:[%s1806_s2 + $0x18] sm:$0xff]  ;;  %vm1471_vm5 = vmmov 0  }
 0x120   :  { %1403 = vcosq.f32 %v243_v27  ;;  %v603_v11 = vpop.permute.xlu1 %602  ;;  %v598_v12 = vpop.permute.xlu0 %597 }
 0x121   :  { %1405 = vsinq.f32 %v243_v27 }
 0x123   :  { %v1400_v29 = vpop.eup %1399 }
 0x124   :  { %v1402_v31 = vpop.eup %1401  ;;  %v359_v36 = vxor.u32 2147483648, %v1400_v29  ;;  %v623_v15 = vpop.permute.xlu1 %622 }
 0x125   :  { %v356_v34 = vxor.u32 2147483648, %v1402_v31  ;;  %v618_v16 = vpop.permute.xlu0 %617 }
 0x126   :  { %v360_v35 = vsel %vm358_vm9, %v359_v36, %v1402_v31  ;;  %v566_v38 = vsel %vm564_vm7, %v359_v36, %v1402_v31 }
 0x127   :  { %v357_v30 = vsel %vm355_vm8, %v1400_v29, %v356_v34  ;;  %v563_v37 = vsel %vm561_vm6, %v1400_v29, %v356_v34 }
 0x128   :  { %v361_v43 = vsel %vm354_vm11, %v357_v30, %v360_v35  ;;  %v567_v44 = vsel %vm560_vm12, %v563_v37, %v566_v38  ;;  %v821_v49 = vpop.permute.xlu1 %820 }
 0x129   :  { %v362_v45 = vsel %vm351_vm10, nan, %v361_v43  ;;  %v568_v54 = vsel %vm351_vm10, nan, %v567_v44  ;;  %v816_v31 = vpop.permute.xlu0 %815 }
 0x12a   :  { %v1404_v39 = vpop.eup %1403 }
 0x12b   :  { %v1406_v50 = vpop.eup %1405  ;;  %v255_v40 = vxor.u32 2147483648, %v1404_v39 }
 0x12c   :  { %v252_v46 = vxor.u32 2147483648, %v1406_v50 }
 0x12d   :  { %v256_v47 = vsel %vm254_vm14, %v255_v40, %v1406_v50  ;;  %v463_v51 = vsel %vm461_vm0, %v255_v40, %v1406_v50 }
 0x12e   :  { %v253_v52 = vsel %vm251_vm3, %v1404_v39, %v252_v46  ;;  %v460_v53 = vsel %vm458_vm15, %v1404_v39, %v252_v46 }
 0x12f   :  { %v257_v55 = vsel %vm250_vm1, %v253_v52, %v256_v47  ;;  %v464_v57 = vsel %vm457_vm13, %v460_v53, %v463_v51 }
 0x130   :  { %v258_v58 = vsel %vm247_vm4, nan, %v257_v55  ;;  %v465_v59 = vsel %vm247_vm4, nan, %v464_v57 }
 0x131   :  { %v1340_v48 = vpack.c.bf16 %v362_v45, %v258_v58  ;;  %v1344_v60 = vpack.c.bf16 %v568_v54, %v465_v59 }
 0x133   :  { %1341 = vmatprep.subr.bf16.mxu1 %v1340_v48 }
 0x134   :  { %1343 = vmatpush3.bf16.msra.mxu1 %v1340_v48 }
 0x135   :  { %1345 = vmatprep.subr.bf16.mxu1 %v1344_v60 }
 0x138   :  { %1347 = vmatpush3.bf16.msra.mxu1 %v1344_v60 }
 0x13b   :  { %1290 = vmatmul.mubr.msk.f32.vlgmr.msra.gmra.mrb[0].mxu1 %vm625_vm2, %v570_v61 }
 0x13c   :  { %1292 = vmatprep.mubr.msk.f32.mxu1 %vm625_vm2, %v571_v18 }
 0x13f   :  { %1293 = vmatmul.mubr.msk.f32.gmra.mrb[2].mxu1 %vm625_vm2, %v572_v21 }
 0x140   :  { %1295 = vmatprep.mubr.msk.f32.mxu1 %vm625_vm2, %v573_v62 }
 0x143   :  { %1296 = vmatmul.mubr.msk.f32.gmra.mrb[4].mxu1 %vm625_vm2, %v574_v56 }
 0x144   :  { %1298 = vmatprep.mubr.msk.f32.mxu1 %vm625_vm2, %v575_v63 }
 0x147   :  { %1299 = vmatmul.mubr.msk.f32.gmra.mrb[6].mxu1 %vm625_vm2, %v576_v0 }
 0x1d8   :  { %v1311_v41 = vpop.f32.mrb[6].mxu0 }
 0x1d9   :  { %v901_v42 = vpop.f32.mrb[7].mxu0  ;;  %v907_v13 = vadd.f32 %v1311_v41, %v811_v8 }
 0x1da   :  { %v902_v20 = vadd.f32 %v901_v42, %v806_v9 }
 0x1db   :  { %1407 = vtanh.f32 %v907_v13 }
 0x1dc   :  { %v1314_v2 = vpop.f32.mrb[8].mxu0  ;;  %1409 = vtanh.f32 %v902_v20 }
 0x1dd   :  { %v911_v3 = vpop.f32.mrb[9].mxu0  ;;  %v917_v17 = vadd.f32 %v1314_v2, %v821_v49  ;;  %v1220_v49 = vld [vmem:[%s1808_s4 + $0x38] sm:$0xff] }
 0x1de   :  { %v912_v34 = vadd.f32 %v911_v3, %v816_v31  ;;  %v1472_v31 = vmov 0.0  }
 0x1df   :  { %1337 = vmatprep.mubr.msk.f32.mxu1 %vm1471_vm5, %v1472_v31 }
 0x1e5   :  { %v1408_v37 = vpop.eup %1407 }
 0x1e6   :  { %v1410_v38 = vpop.eup %1409  ;;  %v925_v52 = vadd.f32 1.0, %v1408_v37 }
 0x1e7   :  { %v924_v54 = vadd.f32 1.0, %v1410_v38 }
 0x1e8   :  { %v929_v56 = vmul.f32 0.5, %v925_v52 }
 0x1e9   :  { %v928_v41 = vmul.f32 0.5, %v924_v54 }
 0x20e   :  { %v1291_v10 = vpop.f32.mrb[0].mxu1 }
 0x20f   :  { %v716_v14 = vpop.f32.mrb[1].mxu1  ;;  %v722_v22 = vadd.f32 %v1291_v10, %v593_v7 }
 0x210   :  { %v717_v23 = vadd.f32 %v716_v14, %v588_v5 }
 0x211   :  { %1411 = vtanh.f32 %v722_v22 }
 0x212   :  { %v1294_v26 = vpop.f32.mrb[2].mxu1  ;;  %1413 = vtanh.f32 %v717_v23 }
 0x213   :  { %v732_v19 = vadd.f32 %v1294_v26, %v603_v11  ;;  %v726_v27 = vpop.f32.mrb[3].mxu1 }
 0x214   :  { %v727_v28 = vadd.f32 %v726_v27, %v598_v12  ;;  %v1218_v27 = vld [vmem:[%s1808_s4 + $0x28] sm:$0xff] }
 0x215   :  { %1415 = vtanh.f32 %v732_v19 }
 0x216   :  { %v1297_v29 = vpop.f32.mrb[4].mxu1  ;;  %1417 = vtanh.f32 %v727_v28  ;;  %v1219_v28 = vld [vmem:[%s1808_s4 + $0x30] sm:$0xff] }
 0x217   :  { %v742_v32 = vadd.f32 %v1297_v29, %v613_v6  ;;  %v736_v33 = vpop.f32.mrb[5].mxu1  ;;  %v1470_v29 = vmov 0.0|0.0  }
 0x218   :  { %v737_v36 = vadd.f32 %v736_v33, %v608_v4  ;;  %1364 = vmatprep.subr.bf16.mxu1 %v1470_v29 }
 0x219   :  { %1419 = vtanh.f32 %v742_v32  ;;  %v953_v32 = vpop.permute.xlu0 %952 }
 0x21a   :  { %1421 = vtanh.f32 %v737_v36  ;;  %v1300_v25 = vpop.f32.mrb[6].mxu1 }
 0x21b   :  { %1423 = vtanh.f32 %v917_v17  ;;  %v752_v24 = vadd.f32 %v1300_v25, %v623_v15  ;;  %v746_v30 = vpop.f32.mrb[7].mxu1  ;;  %v1412_v39 = vpop.eup %1411 }
 0x21c   :  { %1425 = vtanh.f32 %v912_v34  ;;  %v747_v35 = vadd.f32 %v746_v30, %v618_v16  ;;  %v1414_v50 = vpop.eup %1413  ;;  %v764_v44 = vadd.f32 1.0, %v1412_v39  ;;  %v958_v17 = vpop.permute.xlu1 %957 }
 0x21d   :  { %1427 = vtanh.f32 %v752_v24  ;;  %v763_v47 = vadd.f32 1.0, %v1414_v50 }
 0x21e   :  { %1429 = vtanh.f32 %v747_v35  ;;  %v1752_v58 = vmul.f32 0.5, %v764_v44  ;;  %v963_v35 = vpop.permute.xlu0 %962 }
 0x21f   :  { %v1416_v40 = vpop.eup %1415  ;;  %v1754_v61 = vmul.f32 0.5, %v763_v47 }
 0x220   :  { %v1418_v43 = vpop.eup %1417  ;;  %v766_v59 = vadd.f32 1.0, %v1416_v40  ;;  %v968_v24 = vpop.permute.xlu1 %967 }
 0x221   :  { %v765_v18 = vadd.f32 1.0, %v1418_v43 }
 0x222   :  { %v1760_v4 = vmul.f32 0.5, %v766_v59 }
 0x223   :  { %v1420_v46 = vpop.eup %1419  ;;  %v1763_v7 = vmul.f32 0.5, %v765_v18 }
 0x224   :  { %v1422_v51 = vpop.eup %1421  ;;  %v768_v45 = vadd.f32 1.0, %v1420_v46 }
 0x225   :  { %v1424_v53 = vpop.eup %1423  ;;  %v767_v55 = vadd.f32 1.0, %v1422_v51 }
 0x226   :  { %v1426_v57 = vpop.eup %1425  ;;  %v776_v48 = vmul.f32 0.5, %v768_v45  ;;  %v927_v63 = vadd.f32 1.0, %v1424_v53 }
 0x227   :  { %v1428_v60 = vpop.eup %1427  ;;  %v775_v21 = vmul.f32 0.5, %v767_v55  ;;  %v926_v42 = vadd.f32 1.0, %v1426_v57 }
 0x228   :  { %v1430_v62 = vpop.eup %1429  ;;  %v1757_v0 = vsub.f32 %v776_v48, %v1752_v58  ;;  %v770_v1 = vadd.f32 1.0, %v1428_v60  ;;  %v931_v11 = vmul.f32 0.5, %v927_v63 }
 0x229   :  { %v779_v2 = vsub.f32 %v775_v21, %v1754_v61  ;;  %v769_v3 = vadd.f32 1.0, %v1430_v62  ;;  %v930_v13 = vmul.f32 0.5, %v926_v42 }
 0x22a   :  { %v778_v5 = vmul.f32 0.5, %v770_v1  ;;  %v933_v6 = vmul.f32 %v929_v56, %v1757_v0 }
 0x22b   :  { %v777_v8 = vmul.f32 0.5, %v769_v3  ;;  %v932_v9 = vmul.f32 %v928_v41, %v779_v2 }
 0x22c   :  { %v782_v12 = vsub.f32 %v778_v5, %v1760_v4  ;;  %v937_v10 = vadd.f32 %v933_v6, %v1752_v58 }
 0x22d   :  { %v781_v14 = vsub.f32 %v777_v8, %v1763_v7  ;;  %v936_v15 = vadd.f32 %v932_v9, %v1754_v61 }
 0x22e   :  { %v935_v20 = vmul.f32 %v931_v11, %v782_v12 }
 0x22f   :  { %v1356_v16 = vpack.c.bf16 %v937_v10, %v936_v15  ;;  %v934_v22 = vmul.f32 %v930_v13, %v781_v14 }
 0x230   :  { %v939_v23 = vadd.f32 %v935_v20, %v1760_v4 }
 0x231   :  { %1357 = vmatprep.subr.bf16.mxu0 %v1356_v16  ;;  %v938_v26 = vadd.f32 %v934_v22, %v1763_v7 }
 0x232   :  { %1359 = vmatpush3.bf16.msra.mxu0 %v1356_v16 }
 0x233   :  { %v1360_v19 = vpack.c.bf16 %v939_v23, %v938_v26 }
 0x235   :  { %1361 = vmatprep.subr.bf16.mxu0 %v1360_v19 }
 0x236   :  { %1363 = vmatpush3.bf16.msra.mxu0 %v1360_v19 }
 0x239   :  { %1324 = vmatmul.mubr.msk.f32.vlgmr.msra.gmra.mrb[10].mxu0 %vm625_vm2, %v1218_v27 }
 0x23a   :  { %1326 = vmatprep.mubr.msk.f32.mxu0 %vm625_vm2, %v1219_v28 }
 0x23d   :  { %1327 = vmatmul.mubr.msk.f32.gmra.mrb[12].mxu0 %vm625_vm2, %v1220_v49 }
 0x30c   :  { %v1325_v33 = vpop.f32.mrb[10].mxu0 }
 0x30d   :  { %v1054_v34 = vadd.f32 %v1325_v33, %v958_v17  ;;  %v1048_v36 = vpop.f32.mrb[11].mxu0 }
 0x30e   :  { %v1049_v25 = vadd.f32 %v1048_v36, %v953_v32 }
 0x30f   :  { %1431 = vtanh.f32 %v1054_v34 }
 0x310   :  { %1433 = vtanh.f32 %v1049_v25  ;;  %v1328_v30 = vpop.f32.mrb[12].mxu0 }
 0x311   :  { %v1064_v37 = vadd.f32 %v1328_v30, %v968_v24  ;;  %v1058_v38 = vpop.f32.mrb[13].mxu0 }
 0x312   :  { %v1059_v39 = vadd.f32 %v1058_v38, %v963_v35 }
 0x313   :  { %1435 = vtanh.f32 %v1064_v37 }
 0x314   :  { %1437 = vtanh.f32 %v1059_v39 }
 0x319   :  { %v1432_v50 = vpop.eup %1431 }
 0x31a   :  { %v1434_v40 = vpop.eup %1433  ;;  %v1072_v43 = vadd.f32 1.0, %v1432_v50 }
 0x31b   :  { %v1071_v44 = vadd.f32 1.0, %v1434_v40 }
 0x31c   :  { %v1076_v46 = vmul.f32 0.5, %v1072_v43 }
 0x31d   :  { %v1436_v47 = vpop.eup %1435  ;;  %v1075_v51 = vmul.f32 0.5, %v1071_v44 }
 0x31e   :  { %v1438_v52 = vpop.eup %1437  ;;  %v1080_v45 = vmul.f32 %v1076_v46, %v1757_v0  ;;  %v1074_v53 = vadd.f32 1.0, %v1436_v47  ;;  %v1087_v0 = vld [vmem:[%s1810_s6] sm:$0x7] }
 0x31f   :  { %v1079_v54 = vmul.f32 %v1075_v51, %v779_v2  ;;  %v1073_v55 = vadd.f32 1.0, %v1438_v52 }
 0x320   :  { %v1084_v57 = vadd.f32 %v1080_v45, %v1752_v58  ;;  %v1078_v59 = vmul.f32 0.5, %v1074_v53  ;;  %v1092_v58 = vpop.permute.xlu0 %1091 }
 0x321   :  { %v1083_v48 = vadd.f32 %v1079_v54, %v1754_v61  ;;  %v1077_v60 = vmul.f32 0.5, %v1073_v55 }
 0x322   :  { %v1082_v18 = vmul.f32 %v1078_v59, %v782_v12 }
 0x323   :  { %v1081_v21 = vmul.f32 %v1077_v60, %v781_v14  ;;  %v1365_v62 = vpack.c.bf16 %v1084_v57, %v1083_v48 }
 0x324   :  { %v1086_v56 = vadd.f32 %v1082_v18, %v1760_v4 }
 0x325   :  { %v1085_v63 = vadd.f32 %v1081_v21, %v1763_v7  ;;  %1366 = vmatpush3.bf16.msra.mxu1 %v1365_v62 }
 0x326   :  { %1367 = vmatprep.subr.bf16.mxu1 %v1470_v29 }
 0x327   :  { %v1368_v1 = vpack.c.bf16 %v1086_v56, %v1085_v63 }
 0x329   :  { %1369 = vmatpush3.bf16.msra.mxu1 %v1368_v1 }
 0x32c   :  { %1338 = vmatmul.mubr.msk.f32.vlgmr.msra.gmra.mrb[8].mxu1 %vm625_vm2, %v1087_v0 }
 0x3ff   :  { %v1163_v61 = vpop.f32.mrb[8].mxu1 }
 0x400   :  { %v1164_v41 = vadd.f32 %v1163_v61, %v1092_v58  ;;  %v1339_v42 = vpop.f32.mrb[9].mxu1 }
 0x402   :  { %1167 = vst [vmem:[#allocation2] sm:$0x7] %v1164_v41 }
 0x403   :  { %1450 = shalt.err (!%p1447_p4)
}
 0x404   :  { %s1451_s6 = scalar_lea.hbm %s1812_s8, 64 }
 0x405   :  { %p1452_p5 = scmp.ne.s32.totalorder %s1812_s8, %s1451_s6  ;;  %p1455_p6 = scmp.lt.u32.totalorder %s1451_s6, %s1812_s8 }
 0x407   :  { %p1457_p7 = pnand %p1455_p6, %p1452_p5 }
 0x409   :  { %1460 = shalt.err (!%p1457_p7)
}
 0x40a   :  { %1177 = dma.vmem_to_hbm [thread:$0]  %s1175_s30, 64, %s1812_s8, [#allocation3]  }
 0x40b   :  { %1461 = dma.done.wait [#allocation3], 64  }
 0x40c   :  { %1462 = vsyncadd [#allocation3], 4294967232 }
 0x40d   :  { %1181 = vsyncpa [#allocation3], 1 }

// kernel: tpu_custom_call.1
= control target key start
LH: loop header
LB: loop body
LE: loop exit
PB: predicated region body
PF: predicated region fallthrough
CT: control target
= control target key end

     0   :  { %vm56_vm0 = vcmask 1044480   ;;  %vm37_vm1 = vcmask 39936   ;;  %s1804_s0 = inlined_call_operand.vmem [shape: f32[5,128], index: 0, kind: input, shape index: {}]   ;;  %s1805_s1 = inlined_call_operand.vmem [shape: f32[48,5], index: 1, kind: input, shape index: {}]   ;;  %s1806_s2 = inlined_call_operand.vmem [shape: f32[64,32], index: 2, kind: input, shape index: {}]   ;;  %s1807_s3 = inlined_call_operand.vmem [shape: f32[64,1], index: 3, kind: input, shape index: {}]   ;;  %s1808_s4 = inlined_call_operand.vmem [shape: f32[2,32,32], index: 4, kind: input, shape index: {}]   ;;  %s1809_s5 = inlined_call_operand.vmem [shape: f32[2,32,1], index: 5, kind: input, shape index: {}]   ;;  %s1810_s6 = inlined_call_operand.vmem [shape: f32[3,32], index: 6, kind: input, shape index: {}]   ;;  %s1811_s7 = inlined_call_operand.vmem [shape: f32[3,1], index: 7, kind: input, shape index: {}]   ;;  %s1812_s8 = inlined_call_operand.hbm [shape: f32[3,128], index: 8, kind: output, shape index: {}]  }
   0x1   :  { %v30_v0 = vld [vmem:[%s1804_s0] sm:$0x1f]  ;;  %v32_v2 = vld [vmem:[%s1805_s1 + $0x8] sm:$0xff]  ;;  %v33_v3 = vld [vmem:[%s1805_s1 + $0x10] sm:$0xff] }
   0x2   :  { %v31_v1 = vld [vmem:[%s1805_s1] sm:$0xff]  ;;  %1270 = vmatprep.subr.msk.mxu0 %vm56_vm0, %v30_v0 }
   0x3   :  { %1272 = vmatprep.mubr.msk.f32.mxu0 %vm37_vm1, %v31_v1  ;;  %1271 = vmatpush3.msk.msra.mxu0 %vm56_vm0, %v30_v0 }
   0x4   :  { %13 = vsyncpa [#allocation3], 0  ;;  %1273 = vmatmul.mubr.msk.f32.vlgmr.msra.gmra.mrb[0].mxu0 %vm37_vm1, %v32_v2  ;;  %v34_v4 = vld [vmem:[%s1805_s1 + $0x18] sm:$0xff]  ;;  %v35_v5 = vld [vmem:[%s1805_s1 + $0x20] sm:$0xff]  ;;  %vm625_vm2 = vcmask 261120   ;;  %v1463_v11 = vmov 0  }
   0x5   :  { %1275 = vmatprep.mubr.msk.f32.mxu0 %vm37_vm1, %v33_v3  ;;  %v36_v6 = vld [vmem:[%s1805_s1 + $0x28] sm:$0xff]  ;;  %v795_v7 = vld [vmem:[%s1808_s4] sm:$0xff]  ;;  %1389 = vset.pattern.permute.xlu0 %v1463_v11  ;;  %v579_v16 = vld [vmem:[%s1807_s3 + $0x10] sm:$0xff]  ;;  %v1464_v52 = vmov 683565275   ;;  %s1473_s29 = smov [#allocation2]  }
   0x6   :  { %v569_v8 = vld [vmem:[%s1806_s2] sm:$0xff]  ;;  %1390 = vset.pattern.permute.xlu1 %v1463_v11  ;;  %v578_v12 = vld [vmem:[%s1807_s3 + $0x8] sm:$0xff]  ;;  %v580_v17 = vld [vmem:[%s1807_s3 + $0x18] sm:$0xff]  ;;  %v1465_v54 = vmov 2475754826   ;;  %s1174_s30 = sshll.u32 %s1473_s29, 4  ;;  %s1175_s30 = int_to_ptr.vmem [resolvable:$true] %s1174_s30 }
   0x7   :  { %1289 = vmatprep.mubr.msk.f32.mxu1 %vm625_vm2, %v569_v8  ;;  %v577_v9 = vld [vmem:[%s1807_s3] sm:$0xff]  ;;  %v582_v13 = vld [vmem:[%s1807_s3 + $0x28] sm:$0xff]  ;;  %v583_v22 = vld [vmem:[%s1807_s3 + $0x30] sm:$0xff]  ;;  %v1466_v59 = vmov 2131351028   ;;  %s1439_s9 = scalar_lea.vmem %s1175_s30, 64  ;;  %p1444_p1 = scmp.lt.s32.totalorder %s1175_s30, %s1175_s30 }
   0x8   :  { %1276 = vmatmul.mubr.msk.f32.gmra.mrb[2].mxu0 %vm37_vm1, %v34_v4  ;;  %v581_v10 = vld [vmem:[%s1807_s3 + $0x20] sm:$0xff]  ;;  %587 = vperm.xlu0 %1389, %v577_v9   ;;  %v800_v15 = vld [vmem:[%s1809_s5 + $0x8] sm:$0xff]  ;;  %v584_v23 = vld [vmem:[%s1807_s3 + $0x38] sm:$0xff]  ;;  %v1467_v61 = vmov 2102212464   ;;  %p1440_p0 = scmp.ne.s32.totalorder %s1175_s30, %s1439_s9  ;;  %p1445_p2 = scmp.lt.s32.totalorder %s1439_s9, %s1439_s9 }
   0x9   :  { %1278 = vmatprep.mubr.msk.f32.mxu0 %vm37_vm1, %v35_v5  ;;  %607 = vperm.xlu1 %1390, %v581_v10   ;;  %v799_v14 = vld [vmem:[%s1809_s5] sm:$0xff]  ;;  %v801_v33 = vld [vmem:[%s1809_s5 + $0x10] sm:$0xff]  ;;  %v802_v34 = vld [vmem:[%s1809_s5 + $0x18] sm:$0xff]  ;;  %v1468_v63 = vmov 920167782  }
   0xa   :  { %v1221_v42 = vld [vmem:[%s1809_s5 + $0x20] sm:$0xff]  ;;  %v1222_v43 = vld [vmem:[%s1809_s5 + $0x28] sm:$0xff]  ;;  %v1223_v57 = vld [vmem:[%s1809_s5 + $0x30] sm:$0xff]  ;;  %p1446_p3 = por %p1445_p2, %p1444_p1 }
   0xb   :  { %v1224_v58 = vld [vmem:[%s1809_s5 + $0x38] sm:$0xff] }
   0xc   :  { %1279 = vmatmul.mubr.msk.f32.gmra.mrb[4].mxu0 %vm37_vm1, %v36_v6  ;;  %592 = vperm.xlu0 %1389, %v578_v12   ;;  %v1469_v6 = vmov 1326507024   ;;  %v1088_v12 = vld [vmem:[%s1811_s7] sm:$0x7]  ;;  %p1447_p4 = pnand %p1446_p3, %p1440_p0 }
   0xd   :  { %1309 = vmatprep.mubr.msk.f32.mxu0 %vm625_vm2, %v795_v7  ;;  %612 = vperm.xlu1 %1390, %v582_v13  }
  0x10   :  { %805 = vperm.xlu0 %1389, %v799_v14  }
  0x11   :  { %810 = vperm.xlu1 %1390, %v800_v15  }
  0x14   :  { %597 = vperm.xlu0 %1389, %v579_v16  }
  0x15   :  { %602 = vperm.xlu1 %1390, %v580_v17  }
  0x18   :  { %617 = vperm.xlu0 %1389, %v583_v22  }
  0x19   :  { %622 = vperm.xlu1 %1390, %v584_v23  }
  0x1c   :  { %815 = vperm.xlu0 %1389, %v801_v33  }
  0x1d   :  { %820 = vperm.xlu1 %1390, %v802_v34  }
  0x20   :  { %952 = vperm.xlu0 %1389, %v1221_v42  }
  0x21   :  { %957 = vperm.xlu1 %1390, %v1222_v43  }
  0x24   :  { %962 = vperm.xlu0 %1389, %v1223_v57  }
  0x25   :  { %967 = vperm.xlu1 %1390, %v1224_v58  }
  0x28   :  { %1091 = vperm.xlu0 %1389, %v1088_v12  }
  0xd7   :  { %v1572_v18 = vpop.f32.mrb[0].mxu0 }
  0xd8   :  { %v259_v19 = vand.u32 2147483647, %v1572_v18  ;;  %v262_v20 = vand.u32 2139095040, %v1572_v18  ;;  %v1576_v21 = vpop.f32.mrb[1].mxu0  ;;  %vm261_vm1 = vcmp.lt.s32.totalorder %v1572_v18, 0 }
  0xd9   :  { %v155_v24 = vand.u32 2147483647, %v1576_v21  ;;  %v158_v25 = vand.u32 2139095040, %v1576_v21 }
  0xda   :  { %v263_v26 = vshrl.u32 %v262_v20, 23  ;;  %v266_v27 = vand.u32 8388607, %v259_v19 }
  0xdb   :  { %v159_v28 = vshrl.u32 %v158_v25, 23  ;;  %v162_v29 = vand.u32 8388607, %v155_v24  ;;  %v1277_v30 = vpop.f32.mrb[2].mxu0 }
  0xdc   :  { %v1193_v31 = vadd.s32 4294967169, %v263_v26  ;;  %v136_v32 = vpop.f32.mrb[3].mxu0  ;;  %v267_v37 = vor.u32 8388608, %v266_v27  ;;  %1391 = vtanh.f32 %v1277_v30 }
  0xdd   :  { %v1189_v35 = vadd.s32 4294967169, %v159_v28  ;;  %v163_v38 = vor.u32 8388608, %v162_v29  ;;  %1393 = vtanh.f32 %v136_v32 }
  0xde   :  { %v269_v36 = vadd.s32 1, %v1193_v31  ;;  %v1604_v48 = vshll.u32 %v267_v37, 8 }
  0xdf   :  { %v165_v39 = vadd.s32 1, %v1189_v35  ;;  %v1280_v40 = vpop.f32.mrb[4].mxu0  ;;  %v1608_v50 = vshll.u32 %v163_v38, 8 }
  0xe0   :  { %vm270_vm3 = vcmp.gt.s32.totalorder %v269_v36, 0  ;;  %v146_v41 = vpop.f32.mrb[5].mxu0  ;;  %1395 = vtanh.f32 %v1280_v40 }
  0xe1   :  { %v271_v44 = vsel %vm270_vm3, %v269_v36, 0  ;;  %vm166_vm4 = vcmp.gt.s32.totalorder %v165_v39, 0  ;;  %1397 = vtanh.f32 %v146_v41  ;;  %vm260_vm3 = vcmp.le.f32.partialorder %v259_v19, 0.7853982 }
  0xe2   :  { %v1602_v45 = vshrl.u32 %v271_v44, 5  ;;  %v273_v46 = vand.u32 31, %v271_v44  ;;  %v167_v47 = vsel %vm166_vm4, %v165_v39, 0  ;;  %vm157_vm4 = vcmp.lt.s32.totalorder %v1576_v21, 0 }
  0xe3   :  { %v1606_v49 = vshrl.u32 %v167_v47, 5  ;;  %v1610_v56 = vand.u32 31, %v167_v47 }
  0xe4   :  { %v274_v51 = vsub.s32 32, %v273_v46  ;;  %v276_v53 = vshll.u32 %v1464_v52, %v273_v46  ;;  %v279_v55 = vshll.u32 %v1465_v54, %v273_v46  ;;  %v282_v60 = vshll.u32 %v1466_v59, %v273_v46 }
  0xe5   :  { %v285_v62 = vshll.u32 %v1467_v61, %v273_v46  ;;  %v288_v0 = vshll.u32 %v1468_v63, %v273_v46  ;;  %vm291_vm5 = vcmp.lt.s32.totalorder %v1602_v45, 1  ;;  %vm292_vm6 = vcmp.lt.s32.totalorder %v1602_v45, 2 }
  0xe6   :  { %v277_v1 = vshrl.u32 %v1465_v54, %v274_v51  ;;  %v280_v2 = vshrl.u32 %v1466_v59, %v274_v51  ;;  %v283_v3 = vshrl.u32 %v1467_v61, %v274_v51  ;;  %v275_v4 = vshrl.u32 %v1464_v52, %v274_v51  ;;  %v1392_v16 = vpop.eup %1391 }
  0xe7   :  { %v286_v5 = vshrl.u32 %v1468_v63, %v274_v51  ;;  %v289_v7 = vshrl.u32 %v1469_v6, %v274_v51  ;;  %vm293_vm7 = vcmp.lt.s32.totalorder %v1602_v45, 3  ;;  %v170_v11 = vsub.s32 32, %v1610_v56  ;;  %v1394_v25 = vpop.eup %1393 }
  0xe8   :  { %v278_v8 = vor.u32 %v277_v1, %v276_v53  ;;  %v281_v9 = vor.u32 %v280_v2, %v279_v55  ;;  %v284_v10 = vor.u32 %v283_v3, %v282_v60  ;;  %vm294_vm8 = vcmp.lt.s32.totalorder %v1602_v45, 4 }
  0xe9   :  { %v287_v13 = vor.u32 %v286_v5, %v285_v62  ;;  %v290_v14 = vor.u32 %v289_v7, %v288_v0  ;;  %v172_v15 = vshll.u32 %v1464_v52, %v1610_v56  ;;  %v175_v29 = vshll.u32 %v1465_v54, %v1610_v56 }
  0xea   :  { %v295_v17 = vsel %vm291_vm5, %v275_v4, %v278_v8  ;;  %v296_v20 = vsel %vm294_vm8, %v284_v10, 2102212464  ;;  %v299_v22 = vsel %vm291_vm5, %v278_v8, %v281_v9  ;;  %v303_v23 = vsel %vm291_vm5, %v281_v9, %v284_v10  ;;  %v1396_v30 = vpop.eup %1395 }
  0xeb   :  { %v297_v26 = vsel %vm293_vm7, %v281_v9, %v296_v20  ;;  %v300_v27 = vsel %vm294_vm8, %v287_v13, 920167782  ;;  %v304_v28 = vsel %vm294_vm8, %v290_v14, 1326507024  ;;  %v171_v33 = vshrl.u32 %v1464_v52, %v170_v11  ;;  %v1398_v35 = vpop.eup %1397 }
  0xec   :  { %v301_v31 = vsel %vm293_vm7, %v284_v10, %v300_v27  ;;  %v305_v32 = vsel %vm293_vm7, %v287_v13, %v304_v28  ;;  %v173_v34 = vshrl.u32 %v1465_v54, %v170_v11  ;;  %v298_v36 = vsel %vm292_vm6, %v295_v17, %v297_v26 }
  0xed   :  { %v302_v37 = vsel %vm292_vm6, %v299_v22, %v301_v31  ;;  %v306_v38 = vsel %vm292_vm6, %v303_v23, %v305_v32  ;;  %v176_v39 = vshrl.u32 %v1466_v59, %v170_v11  ;;  %v178_v47 = vshll.u32 %v1466_v59, %v1610_v56 }
  0xee   :  { %v1647_v40 = vmul.u32.u64.low %v1604_v48, %v306_v38  ;;  %v1648_v41 = vmul.u32.u64.high %v1604_v48, %v306_v38, %v1647_v40  ;;  %v1651_v42 = vmul.u32.u64.low %v1604_v48, %v302_v37  ;;  %v1652_v43 = vmul.u32.u64.high %v1604_v48, %v302_v37, %v1651_v42 }
  0xef   :  { %v174_v44 = vor.u32 %v173_v34, %v172_v15  ;;  %v177_v46 = vor.u32 %v176_v39, %v175_v29  ;;  %v179_v51 = vshrl.u32 %v1467_v61, %v170_v11  ;;  %v314_v52 = vmul.u32 %v1604_v48, %v298_v36 }
  0xf0   :  { %v181_v45 = vshll.u32 %v1467_v61, %v1610_v56  ;;  %v182_v53 = vshrl.u32 %v1468_v63, %v170_v11  ;;  %v185_v54 = vshrl.u32 %v1469_v6, %v170_v11  ;;  %v184_v57 = vshll.u32 %v1468_v63, %v1610_v56 }
  0xf1   :  { %v180_v55 = vor.u32 %v179_v51, %v178_v47  ;;  %vm187_vm9 = vcmp.lt.s32.totalorder %v1606_v49, 1  ;;  %vm188_vm10 = vcmp.lt.s32.totalorder %v1606_v49, 2  ;;  %vm316_vm11 = vc.u32 %v1648_v41, %v1651_v42  ;;  %v798_v51 = vld [vmem:[%s1808_s4 + $0x18] sm:$0xff] }
  0xf2   :  { %v317_v58 = vadd.s32 1, %v1652_v43  ;;  %v183_v59 = vor.u32 %v182_v53, %v181_v45  ;;  %vm189_vm12 = vcmp.lt.s32.totalorder %v1606_v49, 3  ;;  %v186_v48 = vor.u32 %v185_v54, %v184_v57 }
  0xf3   :  { %vm190_vm13 = vcmp.lt.s32.totalorder %v1606_v49, 4  ;;  %v191_v60 = vsel %vm187_vm9, %v171_v33, %v174_v44  ;;  %v195_v61 = vsel %vm187_vm9, %v174_v44, %v177_v46  ;;  %v199_v0 = vsel %vm187_vm9, %v177_v46, %v180_v55 }
  0xf4   :  { %v318_v62 = vsel %vm316_vm11, %v317_v58, %v1652_v43  ;;  %v192_v56 = vsel %vm190_vm13, %v180_v55, 2102212464  ;;  %v196_v63 = vsel %vm190_vm13, %v183_v59, 920167782  ;;  %v200_v4 = vsel %vm190_vm13, %v186_v48, 1326507024 }
  0xf5   :  { %v319_v1 = vadd.s32 %v318_v62, %v314_v52  ;;  %v193_v2 = vsel %vm189_vm12, %v177_v46, %v192_v56  ;;  %v197_v3 = vsel %vm189_vm12, %v180_v55, %v196_v63  ;;  %v201_v6 = vsel %vm189_vm12, %v183_v59, %v200_v4  ;;  %v797_v43 = vld [vmem:[%s1808_s4 + $0x10] sm:$0xff] }
  0xf6   :  { %v198_v5 = vsel %vm188_vm10, %v195_v61, %v197_v3  ;;  %v788_v7 = vadd.f32 1.0, %v1392_v16  ;;  %v202_v9 = vsel %vm188_vm10, %v199_v0, %v201_v6  ;;  %v194_v12 = vsel %vm188_vm10, %v191_v60, %v193_v2 }
  0xf7   :  { %v320_v8 = vadd.s32 536870912, %v319_v1  ;;  %v1672_v10 = vmul.u32.u64.low %v1608_v50, %v198_v5  ;;  %v1673_v11 = vmul.u32.u64.high %v1608_v50, %v198_v5, %v1672_v10  ;;  %v787_v20 = vadd.f32 1.0, %v1394_v25 }
  0xf8   :  { %v1678_v13 = vmul.u32.u64.low %v1608_v50, %v202_v9  ;;  %v1679_v14 = vmul.u32.u64.high %v1608_v50, %v202_v9, %v1678_v13  ;;  %v792_v15 = vmul.f32 0.5, %v788_v7  ;;  %v790_v16 = vadd.f32 1.0, %v1396_v30 }
  0xf9   :  { %v1681_v17 = vshrl.u32 %v320_v8, 30  ;;  %v789_v22 = vadd.f32 1.0, %v1398_v35  ;;  %v213_v26 = vadd.s32 1, %v1673_v11  ;;  %v791_v27 = vmul.f32 0.5, %v787_v20 }
  0xfa   :  { %v210_v28 = vmul.u32 %v1608_v50, %v194_v12  ;;  %vm212_vm14 = vc.u32 %v1679_v14, %v1672_v10  ;;  %v794_v49 = vmul.f32 0.5, %v790_v16  ;;  %v796_v50 = vld [vmem:[%s1808_s4 + $0x8] sm:$0xff]  ;;  %v315_v52 = vadd.s32 %v1651_v42, %v1648_v41 }
  0xfb   :  { %v322_v23 = vshll.u32 %v1681_v17, 30  ;;  %v793_v29 = vmul.f32 0.5, %v789_v22  ;;  %v214_v32 = vsel %vm212_vm14, %v213_v26, %v1673_v11  ;;  %v1348_v33 = vpack.c.bf16 %v792_v15, %v791_v27 }
  0xfc   :  { %v215_v34 = vadd.s32 %v214_v32, %v210_v28  ;;  %v345_v11 = vsub.s32 4, %v1681_v17  ;;  %vm156_vm5 = vcmp.le.f32.partialorder %v155_v24, 0.7853982  ;;  %vm351_vm10 = vweird.f32 %v1572_v18 }
  0xfd   :  { %v323_v31 = vsub.s32 %v319_v1, %v322_v23  ;;  %v1352_v36 = vpack.c.bf16 %v794_v49, %v793_v29  ;;  %1349 = vmatprep.subr.bf16.mxu0 %v1348_v33  ;;  %v211_v1 = vadd.s32 %v1672_v10, %v1679_v14 }
  0xfe   :  { %v216_v30 = vadd.s32 536870912, %v215_v34  ;;  %1351 = vmatpush3.bf16.msra.mxu0 %v1348_v33  ;;  %v346_v15 = vsel %vm261_vm1, %v345_v11, %v1681_v17 }
  0xff   :  { %v325_v25 = vsub.s32 0, %v323_v31  ;;  %1353 = vmatprep.subr.bf16.mxu0 %v1352_v36  ;;  %v348_v22 = vsel %vm260_vm3, 0, %v346_v15 }
 0x100   :  { %v217_v37 = vshrl.u32 %v216_v30, 30  ;;  %v352_v28 = vadd.s32 3, %v348_v22  ;;  %v559_v17 = vand.u32 3, %v348_v22 }
 0x101   :  { %v1194_v35 = vmin.u32 %v325_v25, %v323_v31 }
 0x102   :  { %v218_v39 = vshll.u32 %v217_v37, 30  ;;  %1355 = vmatpush3.bf16.msra.mxu0 %v1352_v36  ;;  %v241_v20 = vsub.s32 4, %v217_v37  ;;  %v353_v33 = vand.u32 3, %v352_v28  ;;  %vm561_vm6 = vcmp.eq.s32.totalorder %v559_v17, 0 }
 0x103   :  { %v327_v38 = vclz %v1194_v35  ;;  %vm564_vm7 = vcmp.eq.s32.totalorder %v559_v17, 2  ;;  %vm560_vm12 = vcmp.lt.s32.totalorder %v559_v17, 2 }
 0x104   :  { %v219_v44 = vsub.s32 %v215_v34, %v218_v39  ;;  %v242_v26 = vsel %vm157_vm4, %v241_v20, %v217_v37  ;;  %vm355_vm8 = vcmp.eq.s32.totalorder %v353_v33, 0  ;;  %vm358_vm9 = vcmp.eq.s32.totalorder %v353_v33, 2 }
 0x105   :  { %v1195_v40 = vadd.s32 4294967294, %v327_v38  ;;  %1310 = vmatmul.mubr.msk.f32.vlgmr.msra.gmra.mrb[6].mxu0 %vm625_vm2, %v796_v50  ;;  %v244_v49 = vsel %vm156_vm5, 0, %v242_v26  ;;  %vm354_vm11 = vcmp.lt.s32.totalorder %v353_v33, 2 }
 0x106   :  { %v221_v47 = vsub.s32 0, %v219_v44  ;;  %1312 = vmatprep.mubr.msk.f32.mxu0 %vm625_vm2, %v797_v43  ;;  %v248_v32 = vadd.s32 3, %v244_v49  ;;  %v456_v24 = vand.u32 3, %v244_v49 }
 0x107   :  { %vm1196_vm15 = vcmp.lt.s32.totalorder %v1195_v40, 0 }
 0x108   :  { %v330_v46 = vsel %vm1196_vm15, 0, %v1195_v40  ;;  %v1190_v54 = vmin.u32 %v221_v47, %v219_v44  ;;  %v249_v25 = vand.u32 3, %v248_v32  ;;  %vm457_vm13 = vcmp.lt.s32.totalorder %v456_v24, 2 }
 0x109   :  { %v331_v45 = vsub.s32 32, %v330_v46  ;;  %v335_v53 = vsub.s32 4294967266, %v330_v46  ;;  %v332_v55 = vshll.u32 %v323_v31, %v330_v46  ;;  %1313 = vmatmul.mubr.msk.f32.gmra.mrb[8].mxu0 %vm625_vm2, %v798_v51  ;;  %vm458_vm15 = vcmp.eq.s32.totalorder %v456_v24, 0 }
 0x10a   :  { %v223_v59 = vclz %v1190_v54  ;;  %vm254_vm14 = vcmp.eq.s32.totalorder %v249_v25, 2 }
 0x10b   :  { %v333_v57 = vshrl.u32 %v315_v52, %v331_v45  ;;  %v336_v58 = vadd.s32 127, %v335_v53 }
 0x10c   :  { %v1191_v61 = vadd.s32 4294967294, %v223_v59 }
 0x10d   :  { %v334_v48 = vor.u32 %v333_v57, %v332_v55  ;;  %v337_v60 = vshll.u32 %v336_v58, 23 }
 0x10e   :  { %vm1192_vm0 = vcmp.lt.s32.totalorder %v1191_v61, 0 }
 0x10f   :  { %v338_v62 = vor.u32 4788187, %v337_v60  ;;  %v341_v63 = vcvt.s32.f32 %v334_v48  ;;  %v226_v0 = vsel %vm1192_vm0, 0, %v1191_v61  ;;  %vm461_vm0 = vcmp.eq.s32.totalorder %v456_v24, 2  ;;  %v570_v61 = vld [vmem:[%s1806_s2 + $0x8] sm:$0xff] }
 0x110   :  { %v227_v41 = vsub.s32 32, %v226_v0  ;;  %v231_v42 = vsub.s32 4294967266, %v226_v0  ;;  %v228_v3 = vshll.u32 %v219_v44, %v226_v0  ;;  %v576_v0 = vld [vmem:[%s1806_s2 + $0x38] sm:$0xff] }
 0x111   :  { %v339_v56 = vand.u32 2147483647, %v338_v62  ;;  %v573_v62 = vld [vmem:[%s1806_s2 + $0x20] sm:$0xff] }
 0x112   :  { %v229_v4 = vshrl.u32 %v211_v1, %v227_v41  ;;  %v232_v5 = vadd.s32 127, %v231_v42  ;;  %v1217_v1 = vld [vmem:[%s1808_s4 + $0x20] sm:$0xff] }
 0x113   :  { %v342_v2 = vmul.f32 %v341_v63, %v339_v56  ;;  %v574_v56 = vld [vmem:[%s1806_s2 + $0x28] sm:$0xff]  ;;  %v575_v63 = vld [vmem:[%s1806_s2 + $0x30] sm:$0xff]  ;;  %1323 = vmatprep.mubr.msk.f32.mxu0 %vm625_vm2, %v1217_v1 }
 0x114   :  { %v230_v7 = vor.u32 %v229_v4, %v228_v3  ;;  %v233_v8 = vshll.u32 %v232_v5, 23  ;;  %v608_v4 = vpop.permute.xlu1 %607  ;;  %v588_v5 = vpop.permute.xlu0 %587 }
 0x115   :  { %v343_v6 = vxor.u32 2147483648, %v342_v2 }
 0x116   :  { %v234_v10 = vor.u32 4788187, %v233_v8  ;;  %v237_v14 = vcvt.s32.f32 %v230_v7 }
 0x117   :  { %v344_v9 = vsel %vm261_vm1, %v343_v6, %v342_v2  ;;  %vm250_vm1 = vcmp.lt.s32.totalorder %v249_v25, 2 }
 0x118   :  { %v347_v12 = vsel %vm260_vm3, %v1572_v18, %v344_v9  ;;  %v235_v13 = vand.u32 2147483647, %v234_v10  ;;  %vm251_vm3 = vcmp.eq.s32.totalorder %v249_v25, 0  ;;  %v571_v18 = vld [vmem:[%s1806_s2 + $0x10] sm:$0xff]  ;;  %v613_v6 = vpop.permute.xlu1 %612  ;;  %v593_v7 = vpop.permute.xlu0 %592 }
 0x119   :  { %1399 = vcosq.f32 %v347_v12 }
 0x11a   :  { %1401 = vsinq.f32 %v347_v12  ;;  %v238_v16 = vmul.f32 %v237_v14, %v235_v13 }
 0x11c   :  { %v239_v23 = vxor.u32 2147483648, %v238_v16  ;;  %v811_v8 = vpop.permute.xlu1 %810  ;;  %v806_v9 = vpop.permute.xlu0 %805 }
 0x11e   :  { %v240_v19 = vsel %vm157_vm4, %v239_v23, %v238_v16  ;;  %vm247_vm4 = vweird.f32 %v1576_v21 }
 0x11f   :  { %v243_v27 = vsel %vm156_vm5, %v1576_v21, %v240_v19  ;;  %v572_v21 = vld [vmem:[%s1806_s2 + $0x18] sm:$0xff]  ;;  %vm1471_vm5 = vmmov 0  }
 0x120   :  { %1403 = vcosq.f32 %v243_v27  ;;  %v603_v11 = vpop.permute.xlu1 %602  ;;  %v598_v12 = vpop.permute.xlu0 %597 }
 0x121   :  { %1405 = vsinq.f32 %v243_v27 }
 0x123   :  { %v1400_v29 = vpop.eup %1399 }
 0x124   :  { %v1402_v31 = vpop.eup %1401  ;;  %v359_v36 = vxor.u32 2147483648, %v1400_v29  ;;  %v623_v15 = vpop.permute.xlu1 %622 }
 0x125   :  { %v356_v34 = vxor.u32 2147483648, %v1402_v31  ;;  %v618_v16 = vpop.permute.xlu0 %617 }
 0x126   :  { %v360_v35 = vsel %vm358_vm9, %v359_v36, %v1402_v31  ;;  %v566_v38 = vsel %vm564_vm7, %v359_v36, %v1402_v31 }
 0x127   :  { %v357_v30 = vsel %vm355_vm8, %v1400_v29, %v356_v34  ;;  %v563_v37 = vsel %vm561_vm6, %v1400_v29, %v356_v34 }
 0x128   :  { %v361_v43 = vsel %vm354_vm11, %v357_v30, %v360_v35  ;;  %v567_v44 = vsel %vm560_vm12, %v563_v37, %v566_v38  ;;  %v821_v49 = vpop.permute.xlu1 %820 }
 0x129   :  { %v362_v45 = vsel %vm351_vm10, nan, %v361_v43  ;;  %v568_v54 = vsel %vm351_vm10, nan, %v567_v44  ;;  %v816_v31 = vpop.permute.xlu0 %815 }
 0x12a   :  { %v1404_v39 = vpop.eup %1403 }
 0x12b   :  { %v1406_v50 = vpop.eup %1405  ;;  %v255_v40 = vxor.u32 2147483648, %v1404_v39 }
 0x12c   :  { %v252_v46 = vxor.u32 2147483648, %v1406_v50 }
 0x12d   :  { %v256_v47 = vsel %vm254_vm14, %v255_v40, %v1406_v50  ;;  %v463_v51 = vsel %vm461_vm0, %v255_v40, %v1406_v50 }
 0x12e   :  { %v253_v52 = vsel %vm251_vm3, %v1404_v39, %v252_v46  ;;  %v460_v53 = vsel %vm458_vm15, %v1404_v39, %v252_v46 }
 0x12f   :  { %v257_v55 = vsel %vm250_vm1, %v253_v52, %v256_v47  ;;  %v464_v57 = vsel %vm457_vm13, %v460_v53, %v463_v51 }
 0x130   :  { %v258_v58 = vsel %vm247_vm4, nan, %v257_v55  ;;  %v465_v59 = vsel %vm247_vm4, nan, %v464_v57 }
 0x131   :  { %v1340_v48 = vpack.c.bf16 %v362_v45, %v258_v58  ;;  %v1344_v60 = vpack.c.bf16 %v568_v54, %v465_v59 }
 0x133   :  { %1341 = vmatprep.subr.bf16.mxu1 %v1340_v48 }
 0x134   :  { %1343 = vmatpush3.bf16.msra.mxu1 %v1340_v48 }
 0x135   :  { %1345 = vmatprep.subr.bf16.mxu1 %v1344_v60 }
 0x138   :  { %1347 = vmatpush3.bf16.msra.mxu1 %v1344_v60 }
 0x13b   :  { %1290 = vmatmul.mubr.msk.f32.vlgmr.msra.gmra.mrb[0].mxu1 %vm625_vm2, %v570_v61 }
 0x13c   :  { %1292 = vmatprep.mubr.msk.f32.mxu1 %vm625_vm2, %v571_v18 }
 0x13f   :  { %1293 = vmatmul.mubr.msk.f32.gmra.mrb[2].mxu1 %vm625_vm2, %v572_v21 }
 0x140   :  { %1295 = vmatprep.mubr.msk.f32.mxu1 %vm625_vm2, %v573_v62 }
 0x143   :  { %1296 = vmatmul.mubr.msk.f32.gmra.mrb[4].mxu1 %vm625_vm2, %v574_v56 }
 0x144   :  { %1298 = vmatprep.mubr.msk.f32.mxu1 %vm625_vm2, %v575_v63 }
 0x147   :  { %1299 = vmatmul.mubr.msk.f32.gmra.mrb[6].mxu1 %vm625_vm2, %v576_v0 }
 0x1d8   :  { %v1311_v41 = vpop.f32.mrb[6].mxu0 }
 0x1d9   :  { %v901_v42 = vpop.f32.mrb[7].mxu0  ;;  %v907_v13 = vadd.f32 %v1311_v41, %v811_v8 }
 0x1da   :  { %v902_v20 = vadd.f32 %v901_v42, %v806_v9 }
 0x1db   :  { %1407 = vtanh.f32 %v907_v13 }
 0x1dc   :  { %v1314_v2 = vpop.f32.mrb[8].mxu0  ;;  %1409 = vtanh.f32 %v902_v20 }
 0x1dd   :  { %v911_v3 = vpop.f32.mrb[9].mxu0  ;;  %v917_v17 = vadd.f32 %v1314_v2, %v821_v49  ;;  %v1220_v49 = vld [vmem:[%s1808_s4 + $0x38] sm:$0xff] }
 0x1de   :  { %v912_v34 = vadd.f32 %v911_v3, %v816_v31  ;;  %v1472_v31 = vmov 0.0  }
 0x1df   :  { %1337 = vmatprep.mubr.msk.f32.mxu1 %vm1471_vm5, %v1472_v31 }
 0x1e5   :  { %v1408_v37 = vpop.eup %1407 }
 0x1e6   :  { %v1410_v38 = vpop.eup %1409  ;;  %v925_v52 = vadd.f32 1.0, %v1408_v37 }
 0x1e7   :  { %v924_v54 = vadd.f32 1.0, %v1410_v38 }
 0x1e8   :  { %v929_v56 = vmul.f32 0.5, %v925_v52 }
 0x1e9   :  { %v928_v41 = vmul.f32 0.5, %v924_v54 }
 0x20e   :  { %v1291_v10 = vpop.f32.mrb[0].mxu1 }
 0x20f   :  { %v716_v14 = vpop.f32.mrb[1].mxu1  ;;  %v722_v22 = vadd.f32 %v1291_v10, %v593_v7 }
 0x210   :  { %v717_v23 = vadd.f32 %v716_v14, %v588_v5 }
 0x211   :  { %1411 = vtanh.f32 %v722_v22 }
 0x212   :  { %v1294_v26 = vpop.f32.mrb[2].mxu1  ;;  %1413 = vtanh.f32 %v717_v23 }
 0x213   :  { %v732_v19 = vadd.f32 %v1294_v26, %v603_v11  ;;  %v726_v27 = vpop.f32.mrb[3].mxu1 }
 0x214   :  { %v727_v28 = vadd.f32 %v726_v27, %v598_v12  ;;  %v1218_v27 = vld [vmem:[%s1808_s4 + $0x28] sm:$0xff] }
 0x215   :  { %1415 = vtanh.f32 %v732_v19 }
 0x216   :  { %v1297_v29 = vpop.f32.mrb[4].mxu1  ;;  %1417 = vtanh.f32 %v727_v28  ;;  %v1219_v28 = vld [vmem:[%s1808_s4 + $0x30] sm:$0xff] }
 0x217   :  { %v742_v32 = vadd.f32 %v1297_v29, %v613_v6  ;;  %v736_v33 = vpop.f32.mrb[5].mxu1  ;;  %v1470_v29 = vmov 0.0|0.0  }
 0x218   :  { %v737_v36 = vadd.f32 %v736_v33, %v608_v4  ;;  %1364 = vmatprep.subr.bf16.mxu1 %v1470_v29 }
 0x219   :  { %1419 = vtanh.f32 %v742_v32  ;;  %v953_v32 = vpop.permute.xlu0 %952 }
 0x21a   :  { %1421 = vtanh.f32 %v737_v36  ;;  %v1300_v25 = vpop.f32.mrb[6].mxu1 }
 0x21b   :  { %1423 = vtanh.f32 %v917_v17  ;;  %v752_v24 = vadd.f32 %v1300_v25, %v623_v15  ;;  %v746_v30 = vpop.f32.mrb[7].mxu1  ;;  %v1412_v39 = vpop.eup %1411 }
 0x21c   :  { %1425 = vtanh.f32 %v912_v34  ;;  %v747_v35 = vadd.f32 %v746_v30, %v618_v16  ;;  %v1414_v50 = vpop.eup %1413  ;;  %v764_v44 = vadd.f32 1.0, %v1412_v39  ;;  %v958_v17 = vpop.permute.xlu1 %957 }
 0x21d   :  { %1427 = vtanh.f32 %v752_v24  ;;  %v763_v47 = vadd.f32 1.0, %v1414_v50 }
 0x21e   :  { %1429 = vtanh.f32 %v747_v35  ;;  %v1752_v58 = vmul.f32 0.5, %v764_v44  ;;  %v963_v35 = vpop.permute.xlu0 %962 }
 0x21f   :  { %v1416_v40 = vpop.eup %1415  ;;  %v1754_v61 = vmul.f32 0.5, %v763_v47 }
 0x220   :  { %v1418_v43 = vpop.eup %1417  ;;  %v766_v59 = vadd.f32 1.0, %v1416_v40  ;;  %v968_v24 = vpop.permute.xlu1 %967 }
 0x221   :  { %v765_v18 = vadd.f32 1.0, %v1418_v43 }
 0x222   :  { %v1760_v4 = vmul.f32 0.5, %v766_v59 }
 0x223   :  { %v1420_v46 = vpop.eup %1419  ;;  %v1763_v7 = vmul.f32 0.5, %v765_v18 }
 0x224   :  { %v1422_v51 = vpop.eup %1421  ;;  %v768_v45 = vadd.f32 1.0, %v1420_v46 }
 0x225   :  { %v1424_v53 = vpop.eup %1423  ;;  %v767_v55 = vadd.f32 1.0, %v1422_v51 }
 0x226   :  { %v1426_v57 = vpop.eup %1425  ;;  %v776_v48 = vmul.f32 0.5, %v768_v45  ;;  %v927_v63 = vadd.f32 1.0, %v1424_v53 }
 0x227   :  { %v1428_v60 = vpop.eup %1427  ;;  %v775_v21 = vmul.f32 0.5, %v767_v55  ;;  %v926_v42 = vadd.f32 1.0, %v1426_v57 }
 0x228   :  { %v1430_v62 = vpop.eup %1429  ;;  %v1757_v0 = vsub.f32 %v776_v48, %v1752_v58  ;;  %v770_v1 = vadd.f32 1.0, %v1428_v60  ;;  %v931_v11 = vmul.f32 0.5, %v927_v63 }
 0x229   :  { %v779_v2 = vsub.f32 %v775_v21, %v1754_v61  ;;  %v769_v3 = vadd.f32 1.0, %v1430_v62  ;;  %v930_v13 = vmul.f32 0.5, %v926_v42 }
 0x22a   :  { %v778_v5 = vmul.f32 0.5, %v770_v1  ;;  %v933_v6 = vmul.f32 %v929_v56, %v1757_v0 }
 0x22b   :  { %v777_v8 = vmul.f32 0.5, %v769_v3  ;;  %v932_v9 = vmul.f32 %v928_v41, %v779_v2 }
 0x22c   :  { %v782_v12 = vsub.f32 %v778_v5, %v1760_v4  ;;  %v937_v10 = vadd.f32 %v933_v6, %v1752_v58 }
 0x22d   :  { %v781_v14 = vsub.f32 %v777_v8, %v1763_v7  ;;  %v936_v15 = vadd.f32 %v932_v9, %v1754_v61 }
 0x22e   :  { %v935_v20 = vmul.f32 %v931_v11, %v782_v12 }
 0x22f   :  { %v1356_v16 = vpack.c.bf16 %v937_v10, %v936_v15  ;;  %v934_v22 = vmul.f32 %v930_v13, %v781_v14 }
 0x230   :  { %v939_v23 = vadd.f32 %v935_v20, %v1760_v4 }
 0x231   :  { %1357 = vmatprep.subr.bf16.mxu0 %v1356_v16  ;;  %v938_v26 = vadd.f32 %v934_v22, %v1763_v7 }
 0x232   :  { %1359 = vmatpush3.bf16.msra.mxu0 %v1356_v16 }
 0x233   :  { %v1360_v19 = vpack.c.bf16 %v939_v23, %v938_v26 }
 0x235   :  { %1361 = vmatprep.subr.bf16.mxu0 %v1360_v19 }
 0x236   :  { %1363 = vmatpush3.bf16.msra.mxu0 %v1360_v19 }
 0x239   :  { %1324 = vmatmul.mubr.msk.f32.vlgmr.msra.gmra.mrb[10].mxu0 %vm625_vm2, %v1218_v27 }
 0x23a   :  { %1326 = vmatprep.mubr.msk.f32.mxu0 %vm625_vm2, %v1219_v28 }
 0x23d   :  { %1327 = vmatmul.mubr.msk.f32.gmra.mrb[12].mxu0 %vm625_vm2, %v1220_v49 }
 0x30c   :  { %v1325_v33 = vpop.f32.mrb[10].mxu0 }
 0x30d   :  { %v1054_v34 = vadd.f32 %v1325_v33, %v958_v17  ;;  %v1048_v36 = vpop.f32.mrb[11].mxu0 }
 0x30e   :  { %v1049_v25 = vadd.f32 %v1048_v36, %v953_v32 }
 0x30f   :  { %1431 = vtanh.f32 %v1054_v34 }
 0x310   :  { %1433 = vtanh.f32 %v1049_v25  ;;  %v1328_v30 = vpop.f32.mrb[12].mxu0 }
 0x311   :  { %v1064_v37 = vadd.f32 %v1328_v30, %v968_v24  ;;  %v1058_v38 = vpop.f32.mrb[13].mxu0 }
 0x312   :  { %v1059_v39 = vadd.f32 %v1058_v38, %v963_v35 }
 0x313   :  { %1435 = vtanh.f32 %v1064_v37 }
 0x314   :  { %1437 = vtanh.f32 %v1059_v39 }
 0x319   :  { %v1432_v50 = vpop.eup %1431 }
 0x31a   :  { %v1434_v40 = vpop.eup %1433  ;;  %v1072_v43 = vadd.f32 1.0, %v1432_v50 }
 0x31b   :  { %v1071_v44 = vadd.f32 1.0, %v1434_v40 }
 0x31c   :  { %v1076_v46 = vmul.f32 0.5, %v1072_v43 }
 0x31d   :  { %v1436_v47 = vpop.eup %1435  ;;  %v1075_v51 = vmul.f32 0.5, %v1071_v44 }
 0x31e   :  { %v1438_v52 = vpop.eup %1437  ;;  %v1080_v45 = vmul.f32 %v1076_v46, %v1757_v0  ;;  %v1074_v53 = vadd.f32 1.0, %v1436_v47  ;;  %v1087_v0 = vld [vmem:[%s1810_s6] sm:$0x7] }
 0x31f   :  { %v1079_v54 = vmul.f32 %v1075_v51, %v779_v2  ;;  %v1073_v55 = vadd.f32 1.0, %v1438_v52 }
 0x320   :  { %v1084_v57 = vadd.f32 %v1080_v45, %v1752_v58  ;;  %v1078_v59 = vmul.f32 0.5, %v1074_v53  ;;  %v1092_v58 = vpop.permute.xlu0 %1091 }
 0x321   :  { %v1083_v48 = vadd.f32 %v1079_v54, %v1754_v61  ;;  %v1077_v60 = vmul.f32 0.5, %v1073_v55 }
 0x322   :  { %v1082_v18 = vmul.f32 %v1078_v59, %v782_v12 }
 0x323   :  { %v1081_v21 = vmul.f32 %v1077_v60, %v781_v14  ;;  %v1365_v62 = vpack.c.bf16 %v1084_v57, %v1083_v48 }
 0x324   :  { %v1086_v56 = vadd.f32 %v1082_v18, %v1760_v4 }
 0x325   :  { %v1085_v63 = vadd.f32 %v1081_v21, %v1763_v7  ;;  %1366 = vmatpush3.bf16.msra.mxu1 %v1365_v62 }
 0x326   :  { %1367 = vmatprep.subr.bf16.mxu1 %v1470_v29 }
 0x327   :  { %v1368_v1 = vpack.c.bf16 %v1086_v56, %v1085_v63 }
 0x329   :  { %1369 = vmatpush3.bf16.msra.mxu1 %v1368_v1 }
 0x32c   :  { %1338 = vmatmul.mubr.msk.f32.vlgmr.msra.gmra.mrb[8].mxu1 %vm625_vm2, %v1087_v0 }
 0x3ff   :  { %v1163_v61 = vpop.f32.mrb[8].mxu1 }
 0x400   :  { %v1164_v41 = vadd.f32 %v1163_v61, %v1092_v58  ;;  %v1339_v42 = vpop.f32.mrb[9].mxu1 }
 0x402   :  { %1167 = vst [vmem:[#allocation2] sm:$0x7] %v1164_v41 }
 0x403   :  { %1450 = shalt.err (!%p1447_p4)
}
 0x404   :  { %s1451_s6 = scalar_lea.hbm %s1812_s8, 64 }
 0x405   :  { %p1452_p5 = scmp.ne.s32.totalorder %s1812_s8, %s1451_s6  ;;  %p1455_p6 = scmp.lt.u32.totalorder %s1451_s6, %s1812_s8 }
 0x407   :  { %p1457_p7 = pnand %p1455_p6, %p1452_p5 }
 0x409   :  { %1460 = shalt.err (!%p1457_p7)
}
 0x40a   :  { %1177 = dma.vmem_to_hbm [thread:$0]  %s1175_s30, 64, %s1812_s8, [#allocation3]  }
 0x40b   :  { %1461 = dma.done.wait [#allocation3], 64  }
 0x40c   :  { %1462 = vsyncadd [#allocation3], 4294967232 }
 0x40d   :  { %1181 = vsyncpa [#allocation3], 1 }

</bundles_post_ra>
